<compile_context>
chip_gen: v7x
topology: tpu7x:2x2x1
jax: 0.10.0
libtpu: 0.0.40
codegen_flags: <defaults>
</compile_context>

<pallas_src>
import functools

import jax
import jax.numpy as jnp
from jax import lax
from jax.experimental import pallas as pl
from jax.experimental.pallas import tpu as pltpu

EPS = 1e-5        # BatchNorm eps
DROP_P = 0.2      # F.dropout(p=0.2); functional dropout defaults to training=True
C_PAD = 8         # conv1 input channels zero-padded 3 -> 8
TN_MAX = 512      # points-axis tile (multiple of 128, sized for v7x scoped VMEM)


def _round_up(x, m):
    return ((x + m - 1) // m) * m


# ---------------------------------------------------------------------------
# Kernel 1: per-point MLP + running max-pool over points.
# grid = (B, Np // TN); points axis is the reduction ("arbitrary") axis.
# ---------------------------------------------------------------------------
def _backbone_kernel(x_ref, w1_ref, b1_ref, w2_ref, b2_ref, w3_ref, b3_ref,
                     out_ref, acc_ref, *, n_points, tile_n):
    n = pl.program_id(1)

    @pl.when(n == 0)
    def _init():
        # Post-ReLU features are >= 0, so 0 is a safe identity for the running max.
        acc_ref[...] = jnp.zeros_like(acc_ref)

    x = x_ref[0]                                                        # (TN, 8)
    h = jnp.dot(x, w1_ref[...], preferred_element_type=jnp.float32) + b1_ref[...]
    h = jnp.maximum(h, 0.0)                                             # (TN, 64)
    h = jnp.dot(h, w2_ref[...], preferred_element_type=jnp.float32) + b2_ref[...]
    h = jnp.maximum(h, 0.0)                                             # (TN, 128)
    h = jnp.dot(h.astype(jnp.bfloat16), w3_ref[...],                    # bf16 MXU
                preferred_element_type=jnp.float32) + b3_ref[...]
    h = jnp.maximum(h, 0.0)                                             # (TN, 1024)

    if n_points % tile_n != 0:
        # Zero out padded tail points so they cannot win the max (values >= 0).
        row = lax.broadcasted_iota(jnp.int32, (tile_n, 1), 0) + n * tile_n
        h = jnp.where(row < n_points, h, 0.0)

    # torch.max(x, 2)[0] == max over the points axis, accumulated across tiles.
    acc_ref[...] = jnp.maximum(acc_ref[...], jnp.max(h, axis=0, keepdims=True))

    @pl.when(n == pl.num_programs(1) - 1)
    def _store():
        out_ref[...] = acc_ref[...].reshape(1, 1, 1024)


# ---------------------------------------------------------------------------
# Kernel 2: FC head (fc1/bn4 -> fc2/bn5 -> dropout -> fc3 -> log_softmax).
# Single call over the whole (B, 1024) pooled feature (tiny).
# ---------------------------------------------------------------------------
def _head_kernel(p_ref, u_ref, w4_ref, b4_ref, w5_ref, b5_ref, w6_ref, b6_ref,
                 out_ref):
    h = jnp.dot(p_ref[...].astype(jnp.bfloat16), w4_ref[...],
                preferred_element_type=jnp.float32) + b4_ref[...]
    h = jnp.maximum(h, 0.0)                                             # (B, 512)
    h = jnp.dot(h.astype(jnp.bfloat16), w5_ref[...],
                preferred_element_type=jnp.float32) + b5_ref[...]
    h = jnp.maximum(h, 0.0)                                             # (B, 256)

    # dropout(p=0.2), training-mode semantics (as F.dropout default).
    keep = u_ref[...] < (1.0 - DROP_P)
    h = jnp.where(keep, h * (1.0 / (1.0 - DROP_P)), 0.0)

    logits = jnp.dot(h, w6_ref[...], preferred_element_type=jnp.float32) + b6_ref[...]
    m = jnp.max(logits, axis=1, keepdims=True)
    s = logits - m
    lse = jnp.log(jnp.sum(jnp.exp(s), axis=1, keepdims=True))
    out_ref[...] = s - lse                                              # log_softmax


# ---------------------------------------------------------------------------
# Wrappers
# ---------------------------------------------------------------------------
def backbone(x_ncw, w1, b1, w2, b2, w3, b3):
    """x_ncw: (B, 3, N) f32.  Returns pooled features (B, 1024) f32."""
    B, C, N = x_ncw.shape
    assert C == 3
    tn = min(TN_MAX, _round_up(N, 128))          # tile size, multiple of 128
    np_ = _round_up(N, tn)                       # padded points count
    n_tiles = np_ // tn

    # channels-last, pad C 3 -> 8 and N -> Np (zeros; masked in the kernel).
    x = jnp.transpose(x_ncw, (0, 2, 1))
    x = jnp.pad(x, ((0, 0), (0, np_ - N), (0, C_PAD - C)))

    kernel = functools.partial(_backbone_kernel, n_points=N, tile_n=tn)
    out = pl.pallas_call(
        kernel,
        out_shape=jax.ShapeDtypeStruct((B, 1, 1024), jnp.float32),
        grid_spec=pltpu.PrefetchScalarGridSpec(
            num_scalar_prefetch=0,
            grid=(B, n_tiles),
            in_specs=[
                pl.BlockSpec((1, tn, C_PAD), lambda b, n: (b, n, 0)),
                pl.BlockSpec((C_PAD, 64), lambda b, n: (0, 0)),
                pl.BlockSpec((1, 64), lambda b, n: (0, 0)),
                pl.BlockSpec((64, 128), lambda b, n: (0, 0)),
                pl.BlockSpec((1, 128), lambda b, n: (0, 0)),
                pl.BlockSpec((128, 1024), lambda b, n: (0, 0)),
                pl.BlockSpec((1, 1024), lambda b, n: (0, 0)),
            ],
            out_specs=pl.BlockSpec((1, 1, 1024), lambda b, n: (b, 0, 0)),
            scratch_shapes=[pltpu.VMEM((1, 1024), jnp.float32)],
        ),
        compiler_params=pltpu.CompilerParams(
            dimension_semantics=("parallel", "arbitrary")),
    )(x, w1, b1, w2, b2, w3, b3)
    return out.reshape(B, 1024)


def head(pooled, drop_u, w4, b4, w5, b5, w6, b6):
    B = pooled.shape[0]
    return pl.pallas_call(
        _head_kernel,
        out_shape=jax.ShapeDtypeStruct((B, 4), jnp.float32),
        in_specs=[pl.BlockSpec(memory_space=pltpu.MemorySpace.VMEM)] * 8,
        out_specs=pl.BlockSpec(memory_space=pltpu.MemorySpace.VMEM),
    )(pooled, drop_u, w4, b4, w5, b5, w6, b6)


def _dropout_uniforms(key, batch):
    return jax.random.uniform(key, (batch, 256), jnp.float32)


def pointnet_forward(x_ncw, params, drop_key):
    """x_ncw: (B, 3, N) f32 (PyTorch Conv1d layout).  Returns (B, 4) log-probs."""
    (w1, b1), (w2, b2), (w3, b3), (w4, b4), (w5, b5), (w6, b6) = params
    pooled = backbone(x_ncw, w1, b1, w2, b2, w3, b3)
    u = _dropout_uniforms(drop_key, pooled.shape[0])
    return head(pooled, u, w4, b4, w5, b5, w6, b6)


# ---------------------------------------------------------------------------
# Pure-JAX reference (same folded/bf16 params, same dropout randoms)
# ---------------------------------------------------------------------------
def pointnet_reference(x_ncw, params, drop_key):
    (w1, b1), (w2, b2), (w3, b3), (w4, b4), (w5, b5), (w6, b6) = params
    xt = jnp.transpose(x_ncw, (0, 2, 1))                                # (B, N, 3)
    h = jnp.maximum(jnp.dot(xt, w1[:3]) + b1, 0.0)
    h = jnp.maximum(jnp.dot(h, w2) + b2, 0.0)
    h = jnp.maximum(jnp.dot(h.astype(jnp.bfloat16), w3,
                            preferred_element_type=jnp.float32) + b3, 0.0)
    pooled = jnp.max(h, axis=1)                                         # (B, 1024)
    h = jnp.maximum(jnp.dot(pooled.astype(jnp.bfloat16), w4,
                            preferred_element_type=jnp.float32) + b4, 0.0)
    h = jnp.maximum(jnp.dot(h.astype(jnp.bfloat16), w5,
                            preferred_element_type=jnp.float32) + b5, 0.0)
    u = _dropout_uniforms(drop_key, pooled.shape[0])
    h = jnp.where(u < (1.0 - DROP_P), h * (1.0 / (1.0 - DROP_P)), 0.0)
    logits = jnp.dot(h, w6) + b6
    return jax.nn.log_softmax(logits, axis=1)


# ---------------------------------------------------------------------------
# Deterministic parameter init + BatchNorm folding
# ---------------------------------------------------------------------------
def _fold_bn(W, b, gamma, beta, mean, var):
    scale = gamma / jnp.sqrt(var + EPS)
    return W * scale[None, :], (b - mean) * scale + beta


def init_params(key):
    # (C_in, C_out) for conv1, conv2, conv3, fc1, fc2, fc3 (transpose of torch layout)
    dims = [(3, 64), (64, 128), (128, 1024), (1024, 512), (512, 256), (256, 4)]
    params = []
    for i, (din, dout) in enumerate(dims):
        key, k1, k2, k3, k4, k5, k6 = jax.random.split(key, 7)
        bound = 1.0 / (din ** 0.5)
        W = jax.random.uniform(k1, (din, dout), jnp.float32, -bound, bound)
        b = jax.random.uniform(k2, (dout,), jnp.float32, -bound, bound)
        if i < 5:
            # TODO(synk): BatchNorm folded with eval-mode running statistics;
            # training-mode batch-statistic BN is not implemented.
            gamma = jax.random.uniform(k3, (dout,), jnp.float32, 0.5, 1.5)
            beta = jax.random.uniform(k4, (dout,), jnp.float32, -0.1, 0.1)
            mean = jax.random.uniform(k5, (dout,), jnp.float32, -0.1, 0.1)
            var = jax.random.uniform(k6, (dout,), jnp.float32, 0.5, 1.5)
            W, b = _fold_bn(W, b, gamma, beta, mean, var)
        if i == 0:
            W = jnp.pad(W, ((0, C_PAD - din), (0, 0)))        # K: 3 -> 8
        if i in (2, 3, 4):
            W = W.astype(jnp.bfloat16)                        # conv3 / fc1 / fc2
        params.append((W, b.reshape(1, dout)))
    return params


if __name__ == "__main__":
    key = jax.random.PRNGKey(0)
    kx, kp, kd = jax.random.split(key, 3)
    B, N = 2, 16
    x = jax.random.normal(kx, (B, 3, N), jnp.float32)   # PyTorch NCW input layout
    params = init_params(kp)

    out = pointnet_forward(x, params, kd)
    out = jax.block_until_ready(out)

    assert out.shape == (B, 4) and out.dtype == jnp.float32
    # rows of log_softmax must exp-sum to 1
    assert bool(jnp.allclose(jnp.sum(jnp.exp(out), axis=1), 1.0, atol=1e-3))
    # cross-check against the pure-JAX reference (loose tol for MXU precision)
    ref = pointnet_reference(x, params, kd)
    assert bool(jnp.allclose(out, ref, atol=5e-2, rtol=5e-2))
    print("KERNEL_OK")
</pallas_src>

<mosaic_0001>
module attributes {stable_mosaic.version = 11 : i64} {
  func.func @_backbone_kernel(%arg0: i32, %arg1: i32, %arg2: memref<1x128x8xf32, #tpu.memory_space<vmem>>, %arg3: memref<8x64xf32, #tpu.memory_space<vmem>>, %arg4: memref<1x64xf32, #tpu.memory_space<vmem>>, %arg5: memref<64x128xf32, #tpu.memory_space<vmem>>, %arg6: memref<1x128xf32, #tpu.memory_space<vmem>>, %arg7: memref<128x1024xbf16, #tpu.memory_space<vmem>>, %arg8: memref<1x1024xf32, #tpu.memory_space<vmem>>, %arg9: memref<1x1x1024xf32, #tpu.memory_space<vmem>>, %arg10: memref<1x1024xf32, #tpu.memory_space<vmem>>) attributes {dimension_semantics = [#tpu.dimension_semantics<parallel>, #tpu.dimension_semantics<arbitrary>], iteration_bounds = array<i64: 2, 1>, scalar_prefetch = 0 : i64, scratch_operands = 1 : i64, tpu.core_type = #tpu.core_type<tc>, window_params = [{transform_indices = @transform_0, window_bounds = array<i64: 1, 128, 8>}, {pipeline_mode = #tpu.pipeline_mode<synchronous>, transform_indices = @transform_1, window_bounds = array<i64: 8, 64>}, {pipeline_mode = #tpu.pipeline_mode<synchronous>, transform_indices = @transform_2, window_bounds = array<i64: 1, 64>}, {pipeline_mode = #tpu.pipeline_mode<synchronous>, transform_indices = @transform_3, window_bounds = array<i64: 64, 128>}, {pipeline_mode = #tpu.pipeline_mode<synchronous>, transform_indices = @transform_4, window_bounds = array<i64: 1, 128>}, {pipeline_mode = #tpu.pipeline_mode<synchronous>, transform_indices = @transform_5, window_bounds = array<i64: 128, 1024>}, {pipeline_mode = #tpu.pipeline_mode<synchronous>, transform_indices = @transform_6, window_bounds = array<i64: 1, 1024>}, {transform_indices = @transform_7, window_bounds = array<i64: 1, 1, 1024>}]} {
    %c0_i32 = arith.constant 0 : i32
    %0 = arith.cmpi eq, %arg1, %c0_i32 : i32
    %1 = arith.extui %0 : i1 to i32
    %c0_i32_0 = arith.constant 0 : i32
    %2 = arith.cmpi ne, %1, %c0_i32_0 : i32
    scf.if %2 {
      %cst_28 = arith.constant 0.000000e+00 : f32
      %45 = vector.broadcast %cst_28 : f32 to vector<1x1024xf32>
      %c0_29 = arith.constant 0 : index
      %c0_30 = arith.constant 0 : index
      %46 = vector.load %arg10[%c0_29, %c0_30] : memref<1x1024xf32, #tpu.memory_space<vmem>>, vector<1x1024xf32>
      tpu.vector_store %arg10[%c0_29, %c0_30], %45 {strides = array<i32>} : memref<1x1024xf32, #tpu.memory_space<vmem>>, vector<1x1024xf32>,
    } else {
    }
    %c0 = arith.constant 0 : index
    %c0_1 = arith.constant 0 : index
    %c0_2 = arith.constant 0 : index
    %3 = vector.load %arg2[%c0, %c0_1, %c0_2] : memref<1x128x8xf32, #tpu.memory_space<vmem>>, vector<1x128x8xf32>
    %4 = vector.shape_cast %3 : vector<1x128x8xf32> to vector<128x8xf32>
    %c0_3 = arith.constant 0 : index
    %c0_4 = arith.constant 0 : index
    %5 = vector.load %arg3[%c0_3, %c0_4] : memref<8x64xf32, #tpu.memory_space<vmem>>, vector<8x64xf32>
    %cst = arith.constant dense<0.000000e+00> : vector<128x64xf32>
    %6 = tpu.matmul %4, %5, %cst {dimension_numbers = #tpu.dot_dimension_numbers<[1], [0], [0], [1], [0, 0, 1, 1], [], []>} : vector<128x8xf32>, vector<8x64xf32>, vector<128x64xf32> -> vector<128x64xf32>
    %c0_5 = arith.constant 0 : index
    %c0_6 = arith.constant 0 : index
    %7 = vector.load %arg4[%c0_5, %c0_6] : memref<1x64xf32, #tpu.memory_space<vmem>>, vector<1x64xf32>
    %8 = vector.broadcast %7 : vector<1x64xf32> to vector<128x64xf32>
    %9 = arith.addf %6, %8 : vector<128x64xf32>
    %cst_7 = arith.constant 0.000000e+00 : f32
    %10 = vector.broadcast %cst_7 : f32 to vector<128x64xf32>
    %11 = arith.maximumf %9, %10 : vector<128x64xf32>
    %c0_8 = arith.constant 0 : index
    %c0_9 = arith.constant 0 : index
    %12 = vector.load %arg5[%c0_8, %c0_9] : memref<64x128xf32, #tpu.memory_space<vmem>>, vector<64x128xf32>
    %cst_10 = arith.constant dense<0.000000e+00> : vector<128x128xf32>
    %13 = tpu.matmul %11, %12, %cst_10 {dimension_numbers = #tpu.dot_dimension_numbers<[1], [0], [0], [1], [0, 0, 1, 1], [], []>} : vector<128x64xf32>, vector<64x128xf32>, vector<128x128xf32> -> vector<128x128xf32>
    %c0_11 = arith.constant 0 : index
    %c0_12 = arith.constant 0 : index
    %14 = vector.load %arg6[%c0_11, %c0_12] : memref<1x128xf32, #tpu.memory_space<vmem>>, vector<1x128xf32>
    %15 = vector.broadcast %14 : vector<1x128xf32> to vector<128x128xf32>
    %16 = arith.addf %13, %15 : vector<128x128xf32>
    %cst_13 = arith.constant 0.000000e+00 : f32
    %17 = vector.broadcast %cst_13 : f32 to vector<128x128xf32>
    %18 = arith.maximumf %16, %17 : vector<128x128xf32>
    %19 = arith.truncf %18 : vector<128x128xf32> to vector<128x128xbf16>
    %c0_14 = arith.constant 0 : index
    %c0_15 = arith.constant 0 : index
    %20 = vector.load %arg7[%c0_14, %c0_15] : memref<128x1024xbf16, #tpu.memory_space<vmem>>, vector<128x1024xbf16>
    %cst_16 = arith.constant dense<0.000000e+00> : vector<128x1024xf32>
    %21 = tpu.matmul %19, %20, %cst_16 {dimension_numbers = #tpu.dot_dimension_numbers<[1], [0], [0], [1], [0, 0, 1, 1], [], []>} : vector<128x128xbf16>, vector<128x1024xbf16>, vector<128x1024xf32> -> vector<128x1024xf32>
    %c0_17 = arith.constant 0 : index
    %c0_18 = arith.constant 0 : index
    %22 = vector.load %arg8[%c0_17, %c0_18] : memref<1x1024xf32, #tpu.memory_space<vmem>>, vector<1x1024xf32>
    %23 = vector.broadcast %22 : vector<1x1024xf32> to vector<128x1024xf32>
    %24 = arith.addf %21, %23 : vector<128x1024xf32>
    %cst_19 = arith.constant 0.000000e+00 : f32
    %25 = vector.broadcast %cst_19 : f32 to vector<128x1024xf32>
    %26 = arith.maximumf %24, %25 : vector<128x1024xf32>
    %27 = tpu.iota {dimensions = array<i32: 0>} : vector<128x1xi32>
    %c128_i32 = arith.constant 128 : i32
    %28 = arith.muli %arg1, %c128_i32 : i32
    %29 = vector.broadcast %28 : i32 to vector<128x1xi32>
    %30 = arith.addi %27, %29 : vector<128x1xi32>
    %c16_i32 = arith.constant 16 : i32
    %31 = vector.broadcast %c16_i32 : i32 to vector<128x1xi32>
    %32 = arith.cmpi slt, %30, %31 : vector<128x1xi32>
    %cst_20 = arith.constant 0.000000e+00 : f32
    %33 = vector.shape_cast %32 : vector<128x1xi1> to vector<128x1xi1>
    %34 = vector.broadcast %33 : vector<128x1xi1> to vector<128x1024xi1>
    %35 = vector.broadcast %cst_20 : f32 to vector<128x1024xf32>
    %36 = arith.select %34, %26, %35 : vector<128x1024xi1>, vector<128x1024xf32>
    %c0_21 = arith.constant 0 : index
    %c0_22 = arith.constant 0 : index
    %37 = vector.load %arg10[%c0_21, %c0_22] : memref<1x1024xf32, #tpu.memory_space<vmem>>, vector<1x1024xf32>
    %cst_23 = arith.constant dense<0xFF800000> : vector<1024xf32>
    %38 = vector.multi_reduction <maximumf>, %36, %cst_23 [0] : vector<128x1024xf32> to vector<1024xf32>
    %39 = vector.shape_cast %38 : vector<1024xf32> to vector<1x1024xf32>
    %40 = arith.maximumf %37, %39 : vector<1x1024xf32>
    %c0_24 = arith.constant 0 : index
    %c0_25 = arith.constant 0 : index
    %41 = vector.load %arg10[%c0_24, %c0_25] : memref<1x1024xf32, #tpu.memory_space<vmem>>, vector<1x1024xf32>
    tpu.vector_store %arg10[%c0_24, %c0_25], %40 {strides = array<i32>} : memref<1x1024xf32, #tpu.memory_space<vmem>>, vector<1x1024xf32>,
    %c0_i32_26 = arith.constant 0 : i32
    %42 = arith.cmpi eq, %arg1, %c0_i32_26 : i32
    %43 = arith.extui %42 : i1 to i32
    %c0_i32_27 = arith.constant 0 : i32
    %44 = arith.cmpi ne, %43, %c0_i32_27 : i32
    scf.if %44 {
      %c0_28 = arith.constant 0 : index
      %c0_29 = arith.constant 0 : index
      %45 = vector.load %arg10[%c0_28, %c0_29] : memref<1x1024xf32, #tpu.memory_space<vmem>>, vector<1x1024xf32>
      %46 = vector.shape_cast %45 : vector<1x1024xf32> to vector<1x1x1024xf32>
      %c0_30 = arith.constant 0 : index
      %c0_31 = arith.constant 0 : index
      %c0_32 = arith.constant 0 : index
      %47 = vector.load %arg9[%c0_30, %c0_31, %c0_32] : memref<1x1x1024xf32, #tpu.memory_space<vmem>>, vector<1x1x1024xf32>
      tpu.vector_store %arg9[%c0_30, %c0_31, %c0_32], %46 {strides = array<i32>} : memref<1x1x1024xf32, #tpu.memory_space<vmem>>, vector<1x1x1024xf32>,
    } else {
    }
    return
  }
  func.func @transform_0(%arg0: i32, %arg1: i32) -> (i32, i32, i32) {
    %c0_i32 = arith.constant 0 : i32
    %c0_i32_0 = arith.constant 0 : i32
    return %arg0, %arg1, %c0_i32 : i32, i32, i32
  }
  func.func @transform_1(%arg0: i32, %arg1: i32) -> (i32, i32) {
    %c0_i32 = arith.constant 0 : i32
    %c0_i32_0 = arith.constant 0 : i32
    %c0_i32_1 = arith.constant 0 : i32
    return %c0_i32, %c0_i32_0 : i32, i32
  }
  func.func @transform_2(%arg0: i32, %arg1: i32) -> (i32, i32) {
    %c0_i32 = arith.constant 0 : i32
    %c0_i32_0 = arith.constant 0 : i32
    %c0_i32_1 = arith.constant 0 : i32
    return %c0_i32, %c0_i32_0 : i32, i32
  }
  func.func @transform_3(%arg0: i32, %arg1: i32) -> (i32, i32) {
    %c0_i32 = arith.constant 0 : i32
    %c0_i32_0 = arith.constant 0 : i32
    %c0_i32_1 = arith.constant 0 : i32
    return %c0_i32, %c0_i32_0 : i32, i32
  }
  func.func @transform_4(%arg0: i32, %arg1: i32) -> (i32, i32) {
    %c0_i32 = arith.constant 0 : i32
    %c0_i32_0 = arith.constant 0 : i32
    %c0_i32_1 = arith.constant 0 : i32
    return %c0_i32, %c0_i32_0 : i32, i32
  }
  func.func @transform_5(%arg0: i32, %arg1: i32) -> (i32, i32) {
    %c0_i32 = arith.constant 0 : i32
    %c0_i32_0 = arith.constant 0 : i32
    %c0_i32_1 = arith.constant 0 : i32
    return %c0_i32, %c0_i32_0 : i32, i32
  }
  func.func @transform_6(%arg0: i32, %arg1: i32) -> (i32, i32) {
    %c0_i32 = arith.constant 0 : i32
    %c0_i32_0 = arith.constant 0 : i32
    %c0_i32_1 = arith.constant 0 : i32
    return %c0_i32, %c0_i32_0 : i32, i32
  }
  func.func @transform_7(%arg0: i32, %arg1: i32) -> (i32, i32, i32) {
    %c0_i32 = arith.constant 0 : i32
    %c0_i32_0 = arith.constant 0 : i32
    %c0_i32_1 = arith.constant 0 : i32
    return %arg0, %c0_i32, %c0_i32_0 : i32, i32, i32
  }
}

</mosaic_0001>

<bundles_post_ra>
// kernel: tpu_custom_call.1
= control target key start
LH: loop header
LB: loop body
LE: loop exit
PB: predicated region body
PF: predicated region fallthrough
CT: control target
= control target key end

     0   :  { %12 = vsyncpa [#allocation4], 0  ;;  %s3206_s0 = inlined_call_operand.vmem [shape: f32[2,128,8], index: 0, kind: input, shape index: {}]   ;;  %s3207_s1 = inlined_call_operand.vmem [shape: f32[8,64], index: 1, kind: input, shape index: {}]   ;;  %s3208_s2 = inlined_call_operand.vmem [shape: f32[1,64], index: 2, kind: input, shape index: {}]   ;;  %s3209_s3 = inlined_call_operand.vmem [shape: f32[64,128], index: 3, kind: input, shape index: {}]   ;;  %s3210_s4 = inlined_call_operand.vmem [shape: f32[1,128], index: 4, kind: input, shape index: {}]   ;;  %s3211_s5 = inlined_call_operand.hbm [shape: bf16[128,1024], index: 5, kind: input, shape index: {}]   ;;  %s3212_s6 = inlined_call_operand.vmem [shape: f32[1,1024], index: 6, kind: input, shape index: {}]   ;;  %s3213_s7 = inlined_call_operand.hbm [shape: f32[2,1,1024], index: 7, kind: output, shape index: {}]  }
   0x1   :  { %13 = vsyncpa [#allocation5], 0 }
   0x2   :  { %15 = vsyncpa [#allocation5 + $0x1], 0  ;;  %s2810_s24 = smov 0   ;;  %s2812_s25 = smov 0  }
   0x3   :  { %s2814_s26 = smov 0   ;;  %s2816_s27 = smov 0  }
   0x4   :  { %s2818_s28 = smov 0   ;;  %s2820_s29 = smov 0  }
   0x5 LB: > { %s2344_s30 = sadd.s32 4294967295, %s2762_s29   ;;  %s2345_s8 = sadd.s32 4294967294, %s2762_s29   ;;  %s2762_s29 = sphi %s2820_s29, %s21_s29   ;;  %s2758_s28 = sphi %s2818_s28, %s3231_s28   ;;  %s2754_s27 = sphi %s2816_s27, %s3230_s27   ;;  %s2750_s26 = sphi %s2814_s26, %s3229_s26   ;;  %s2746_s25 = sphi %s2812_s25, %s3228_s25   ;;  %s2742_s24 = sphi %s2810_s24, %s3227_s24  }
   0x6   : > { %s33_s9 = sadd.s32 1, %s2758_s28  ;;  %s194_s10 = sadd.s32 1, %s2750_s26 }
   0x7   : > { %p35_p0 = scmp.ge.s32.totalorder %s33_s9, 2  ;;  %p204_p1 = scmp.ne.s32.totalorder %s2750_s26, %s2746_s25 }
   0x8   : > { %p205_p2 = scmp.eq.s32.totalorder %s2344_s30, 1  ;;  %p210_p3 = scmp.ne.s32.totalorder %s2746_s25, %s2742_s24 }
   0x9   : > { %s3233_s9 = smov (%p35_p0, %s33_s9), 0  ;;  %p211_p5 = scmp.eq.s32.totalorder %s2345_s8, 1 }
   0xa   : > { %p2850_p4 = por %p205_p2, %p204_p1  ;;  %s191_s12 = ssub.s32 %s2758_s28, %s3233_s9 }
   0xb   : > { %p2346_p6 = scmp.ge.s32.totalorder %s2762_s29, 1  ;;  %p192_p7 = scmp.eq.s32.totalorder %s191_s12, 0 }
   0xc   : > { %s3218_s11 = scalar_select %p2850_p4, 1, 0 }
   0xd   : > { %p2857_p8 = por %p211_p5, %p210_p3  ;;  %p218_p9 = scmp.lt.s32.totalorder %s2762_s29, 3 }
   0xe   : > { %s2863_s14 = scalar_select %p192_p7, %s2750_s26, %s194_s10  }
   0xf   : > { %s3219_s13 = scalar_select %p2857_p8, 1, 0 }
  0x10   : > { %p2865_p10 = pnand %p2346_p6, %p218_p9  ;;  %p2869_p11 = scmp.eq.s32.totalorder %s2344_s30, 0 }
  0x11   : > { %s2764_s17 = smov [#allocation3]   ;;  %s2652_s22 = scalar_lea.hbm %s3211_s5, 8192 }
  0x12   : > { %s3220_s15 = scalar_select %p2865_p10, 1, 0 }
  0x13   : > { %s3221_s16 = scalar_select %p2869_p11, 1, 0 }
  0x14   : > { %p2588_p12 = pneg %p2865_p10  ;;  %s242_s18 = sshll.u32 %s2764_s17, 4  ;;  %s243_s18 = int_to_ptr.vmem [resolvable:$true] %s242_s18 }
  0x15   : > { %p2653_p0 = scmp.ne.s32.totalorder %s3211_s5, %s2652_s22  ;;  %p2659_p5 = scmp.lt.u32.totalorder %s2652_s22, %s3211_s5 }
  0x16   : > { %p2877_p13 = pnand %p2869_p11, %p2588_p12 }
  0x18   : > { %p2654_p1 = pneg %p2877_p13 }
  0x1a   : > { %p2655_p2 = pnand %p2654_p1, %p2653_p0 }
  0x1c   : > { %p2656_p3 = pneg %p2655_p2 }
  0x1e   : > { %p2661_p6 = pnand %p2659_p5, %p2656_p3 }
  0x20   : > { %2664 = shalt.err (!%p2661_p6)
}
  0x21   : > { %s2665_s12 = scalar_lea.vmem %s243_s18, 8192  ;;  %p2673_p8 = scmp.lt.s32.totalorder %s243_s18, %s243_s18 }
  0x22   : > { %p2666_p7 = scmp.ne.s32.totalorder %s243_s18, %s2665_s12  ;;  %p2674_p4 = scmp.lt.s32.totalorder %s2665_s12, %s2665_s12 }
  0x24   : > { %p2668_p9 = pnand %p2666_p7, %p2654_p1  ;;  %p2675_p11 = por %p2674_p4, %p2673_p8 }
  0x26   : > { %p2669_p12 = pneg %p2668_p9 }
  0x28   : > { %p2676_p10 = pnand %p2675_p11, %p2669_p12 }
  0x2a   : > { %2679 = shalt.err (!%p2676_p10)
}
  0x2b   : > { %s2765_s17 = smov 512   ;;  %s2766_s20 = smov 32  }
  0x2c   : > { %2591 = dma.hbm_to_vmem [thread:$0]  (!%p2877_p13), %s3211_s5, 8192, %s243_s18, [#allocation4], %s2765_s17, %s2765_s17, %s2766_s20  }
  0x2d   : > { %p3223_p0 = scmp.ne.s32.totalorder %s3220_s15, 0 }
  0x2e   : > { %p3224_p2 = scmp.ne.s32.totalorder (!%p3223_p0), %s3221_s16, 0 }
  0x2f   : > { %274 = sbr.rel (%p3223_p0) target bundleno = 851 (0x353), region = 48 }
  0x36   : > { %2733 = dma.done.wait (%p3224_p2), [#allocation4], 8192  }
  0x37   : > { %2735 = vsyncadd (%p3224_p2), [#allocation4], 4294959104  ;;  %p311_p4 = scmp.lt.s32.totalorder %s2754_s27, 1  ;;  %vm350_vm0 = vcmask 64512   ;;  %v342_v0 = vld [vmem:[%s3207_s1] sm:$0xff]  ;;  %v561_v7 = vld [vmem:[%s3209_s3 + $0x8] sm:$0xff] }
  0x38   : > { %2500 = vmatprep.subr.mxu0 %v342_v0  ;;  %v560_v6 = vld [vmem:[%s3209_s3] sm:$0xff]  ;;  %v562_v8 = vld [vmem:[%s3209_s3 + $0x10] sm:$0xff]  ;;  %v563_v9 = vld [vmem:[%s3209_s3 + $0x18] sm:$0xff]  ;;  %vm575_vm1 = vcmask 523264   ;;  %s307_s19 = sand.u32 1, %s2746_s25   ;;  %s2458_s18 = sshll.u32 %s2754_s27, 7 }
  0x39   : > { %s312_s22 = scalar_select %p311_p4, %s2754_s27, 1  ;;  %2501 = vmatpush3.msra.mxu0 %v342_v0  ;;  %v2566_v10 = vpack.c.bf16 %v561_v7, %v560_v6  ;;  %v2570_v11 = vpack.c.bf16 %v563_v9, %v562_v8  ;;  %v564_v13 = vld [vmem:[%s3209_s3 + $0x20] sm:$0xff]  ;;  %v565_v14 = vld [vmem:[%s3209_s3 + $0x28] sm:$0xff]  ;;  %v566_v26 = vld [vmem:[%s3209_s3 + $0x30] sm:$0xff] }
  0x3a   : > { %v2574_v16 = vpack.c.bf16 %v565_v14, %v564_v13  ;;  %v567_v27 = vld [vmem:[%s3209_s3 + $0x38] sm:$0xff]  ;;  %v793_v29 = vld [vmem:[#allocation3] sm:$0xff]  ;;  %v2969_v31 = vld [vmem:[#allocation3 + $0x8] sm:$0xff]  ;;  %s2351_s15 = sshll.u32 %s307_s19, 3  ;;  %s2245_s27 = scalar_lea.sflag [#allocation5], %s307_s19 }
  0x3b   : > { %s2457_s30 = sshll.u32 %s312_s22, 7  ;;  %2567 = vmatprep.subr.bf16.mxu1 %v2566_v10  ;;  %v2578_v28 = vpack.c.bf16 %v567_v27, %v566_v26  ;;  %v797_v30 = vld [vmem:[#allocation3 + $0x20] sm:$0xff]  ;;  %v2971_v34 = vld [vmem:[#allocation3 + $0x28] sm:$0xff]  ;;  %s309_s16 = scalar_lea.vmem [#allocation6], %s2351_s15 }
  0x3c   : > { %s2908_s10 = scalar_lea.vmem %s3206_s0, %s2457_s30  ;;  %2569 = vmatpush3.bf16.msra.mxu1 %v2566_v10  ;;  %v2388_v32 = vcombine.low %v793_v29, %v797_v30  ;;  %v2389_v33 = vcombine.high %v793_v29, %v797_v30  ;;  %v801_v35 = vld [vmem:[#allocation3 + $0x40] sm:$0xff]  ;;  %v2390_v37 = vcombine.low %v2969_v31, %v2971_v34  ;;  %v2391_v38 = vcombine.high %v2969_v31, %v2971_v34  ;;  %v826_v31 = vld [vmem:[#allocation3 + $0x108] sm:$0xff]  ;;  %s2259_s12 = sshll.u32 %s309_s16, 4  ;;  %s3159_s12 = int_to_ptr.vmem [resolvable:$true] %s2259_s12 }
  0x3d   : > { %v326_v1 = vld [vmem:[%s2908_s10] sm:$0xff]  ;;  %v327_v2 = vld [vmem:[%s2908_s10 + $0x8] sm:$0xff]  ;;  %v328_v3 = vld [vmem:[%s2908_s10 + $0x10] sm:$0xff]  ;;  %2571 = vmatprep.subr.bf16.mxu1 %v2570_v11  ;;  %s2680_s21 = scalar_lea.vmem %s3159_s12, 128  ;;  %p3225_p10 = scmp.ne.s32.totalorder %s3218_s11, 0 }
  0x3e   : > { %2502 = vmatprep.mubr.msk.f32.mxu0 %vm350_vm0, %v326_v1  ;;  %v329_v4 = vld [vmem:[%s2908_s10 + $0x18] sm:$0xff]  ;;  %v330_v5 = vld [vmem:[%s2908_s10 + $0x20] sm:$0xff]  ;;  %v331_v12 = vld [vmem:[%s2908_s10 + $0x28] sm:$0xff]  ;;  %1219 = vmatprep.subr.bf16.mxu0 %v2389_v33  ;;  %p2681_p8 = scmp.ne.s32.totalorder %s3159_s12, %s2680_s21  ;;  %s2769_s23 = smov [#allocation6]  }
  0x3f   : > { %2503 = vmatmul.mubr.msk.f32.vlgmr.msra.gmra.mrb[0].mxu0 %vm350_vm0, %v327_v2  ;;  %v332_v15 = vld [vmem:[%s2908_s10 + $0x30] sm:$0xff]  ;;  %v333_v17 = vld [vmem:[%s2908_s10 + $0x38] sm:$0xff]  ;;  %v334_v18 = vld [vmem:[%s2908_s10 + $0x40] sm:$0xff]  ;;  %s2684_s22 = sshll.u32 %s2769_s23, 4  ;;  %s2685_s22 = int_to_ptr.vmem [resolvable:$false] %s2684_s22 }
  0x40   : > { %2505 = vmatprep.mubr.msk.f32.mxu0 %vm350_vm0, %v328_v3  ;;  %2573 = vmatpush3.bf16.msra.mxu1 %v2570_v11  ;;  %v335_v19 = vld [vmem:[%s2908_s10 + $0x48] sm:$0xff]  ;;  %v336_v20 = vld [vmem:[%s2908_s10 + $0x50] sm:$0xff]  ;;  %v337_v21 = vld [vmem:[%s2908_s10 + $0x58] sm:$0xff]  ;;  %p2682_p11 = pnand %p2681_p8, %p3225_p10  ;;  %s2686_s30 = scalar_lea.vmem %s2685_s22, 256 }
  0x41   : > { %2575 = vmatprep.subr.bf16.mxu1 %v2574_v16  ;;  %v338_v22 = vld [vmem:[%s2908_s10 + $0x60] sm:$0xff]  ;;  %v339_v23 = vld [vmem:[%s2908_s10 + $0x68] sm:$0xff]  ;;  %v340_v24 = vld [vmem:[%s2908_s10 + $0x70] sm:$0xff]  ;;  %1220 = vmatpush1.bf16.msra.mxu0 %v2388_v32  ;;  %p2687_p1 = scmp.lt.s32.totalorder %s3159_s12, %s2685_s22  ;;  %p2688_p3 = scmp.lt.s32.totalorder %s2686_s30, %s2680_s21 }
  0x42   : > { %v341_v25 = vld [vmem:[%s2908_s10 + $0x78] sm:$0xff]  ;;  %v805_v36 = vld [vmem:[#allocation3 + $0x60] sm:$0xff]  ;;  %v802_v2 = vld [vmem:[#allocation3 + $0x48] sm:$0xff]  ;;  %s3157_s10 = scalar_lea.hbm %s3213_s7, %s2458_s18  ;;  %p2683_p13 = pneg %p2682_p11 }
  0x43   : > { %2506 = vmatmul.mubr.msk.f32.gmra.mrb[2].mxu0 %vm350_vm0, %v329_v4  ;;  %v2397_v39 = vcombine.high %v801_v35, %v805_v36  ;;  %v809_v40 = vld [vmem:[#allocation3 + $0x80] sm:$0xff]  ;;  %v2396_v42 = vcombine.low %v801_v35, %v805_v36  ;;  %v806_v3 = vld [vmem:[#allocation3 + $0x68] sm:$0xff]  ;;  %p2689_p5 = por %p2688_p3, %p2687_p1 }
  0x44   : > { %2508 = vmatprep.mubr.msk.f32.mxu0 %vm350_vm0, %v330_v5  ;;  %2577 = vmatpush3.bf16.msra.mxu1 %v2574_v16  ;;  %v813_v41 = vld [vmem:[#allocation3 + $0xa0] sm:$0xff]  ;;  %v2399_v9 = vcombine.high %v802_v2, %v806_v3  ;;  %v810_v11 = vld [vmem:[#allocation3 + $0x88] sm:$0xff]  ;;  %v2398_v16 = vcombine.low %v802_v2, %v806_v3 }
  0x45   : > { %2579 = vmatprep.subr.bf16.mxu1 %v2578_v28  ;;  %1221 = vmatprep.subr.bf16.mxu0 %v2397_v39  ;;  %v2405_v43 = vcombine.high %v809_v40, %v813_v41  ;;  %v817_v44 = vld [vmem:[#allocation3 + $0xc0] sm:$0xff]  ;;  %v2404_v46 = vcombine.low %v809_v40, %v813_v41  ;;  %v830_v32 = vld [vmem:[#allocation3 + $0x128] sm:$0xff]  ;;  %p2690_p6 = pnand %p2689_p5, %p2683_p13 }
  0x46   : > { %v821_v45 = vld [vmem:[#allocation3 + $0xe0] sm:$0xff]  ;;  %1222 = vmatpush1.bf16.msra.mxu0 %v2396_v42  ;;  %v2423_v39 = vcombine.high %v826_v31, %v830_v32  ;;  %v834_v41 = vld [vmem:[#allocation3 + $0x148] sm:$0xff] }
  0x47   : > { %2509 = vmatmul.mubr.msk.f32.gmra.mrb[4].mxu0 %vm350_vm0, %v331_v12  ;;  %1223 = vmatprep.subr.bf16.mxu0 %v2405_v43  ;;  %v2413_v47 = vcombine.high %v817_v44, %v821_v45  ;;  %v825_v48 = vld [vmem:[#allocation3 + $0x100] sm:$0xff]  ;;  %v2412_v50 = vcombine.low %v817_v44, %v821_v45  ;;  %v814_v12 = vld [vmem:[#allocation3 + $0xa8] sm:$0xff] }
  0x48   : > { %2511 = vmatprep.mubr.msk.f32.mxu0 %vm350_vm0, %v332_v15  ;;  %2581 = vmatpush3.bf16.msra.mxu1 %v2578_v28  ;;  %v829_v49 = vld [vmem:[#allocation3 + $0x120] sm:$0xff]  ;;  %v2406_v26 = vcombine.low %v810_v11, %v814_v12  ;;  %v838_v42 = vld [vmem:[#allocation3 + $0x168] sm:$0xff] }
  0x49   : > { %1332 = vmatprep.subr.bf16.mxu1 %v2391_v38  ;;  %v2421_v51 = vcombine.high %v825_v48, %v829_v49  ;;  %v833_v52 = vld [vmem:[#allocation3 + $0x140] sm:$0xff]  ;;  %v2420_v54 = vcombine.low %v825_v48, %v829_v49  ;;  %v2431_v49 = vcombine.high %v834_v41, %v838_v42 }
  0x4a   : > { %1224 = vmatpush1.bf16.msra.mxu0 %v2404_v46  ;;  %v837_v53 = vld [vmem:[#allocation3 + $0x160] sm:$0xff]  ;;  %v2422_v46 = vcombine.low %v826_v31, %v830_v32  ;;  %v807_v32 = vld [vmem:[#allocation3 + $0x70] sm:$0xff] }
  0x4b   : > { %2512 = vmatmul.mubr.msk.f32.gmra.mrb[6].mxu0 %vm350_vm0, %v333_v17  ;;  %1225 = vmatprep.subr.bf16.mxu0 %v2413_v47  ;;  %v2429_v55 = vcombine.high %v833_v52, %v837_v53  ;;  %v841_v56 = vld [vmem:[#allocation3 + $0x180] sm:$0xff]  ;;  %v2428_v58 = vcombine.low %v833_v52, %v837_v53  ;;  %v846_v52 = vld [vmem:[#allocation3 + $0x1a8] sm:$0xff] }
  0x4c   : > { %2514 = vmatprep.mubr.msk.f32.mxu0 %vm350_vm0, %v334_v18  ;;  %v845_v57 = vld [vmem:[#allocation3 + $0x1a0] sm:$0xff] }
  0x4d   : > { %v2437_v59 = vcombine.high %v841_v56, %v845_v57  ;;  %v2436_v60 = vcombine.low %v841_v56, %v845_v57  ;;  %v2980_v61 = vld [vmem:[%s3208_s2] ss:$0 sm:$0xff]  ;;  %v2430_v56 = vcombine.low %v834_v41, %v838_v42 }
  0x4e   : > { %1226 = vmatpush1.bf16.msra.mxu0 %v2412_v50 }
  0x4f   : > { %2515 = vmatmul.mubr.msk.f32.gmra.mrb[8].mxu0 %vm350_vm0, %v335_v19  ;;  %1227 = vmatprep.subr.bf16.mxu0 %v2421_v51  ;;  %v2407_v19 = vcombine.high %v810_v11, %v814_v12  ;;  %v842_v51 = vld [vmem:[#allocation3 + $0x188] sm:$0xff] }
  0x50   : > { %2517 = vmatprep.mubr.msk.f32.mxu0 %vm350_vm0, %v336_v20  ;;  %v854_v11 = vld [vmem:[#allocation3 + $0x1e8] sm:$0xff] }
  0x52   : > { %1228 = vmatpush1.bf16.msra.mxu0 %v2420_v54 }
  0x53   : > { %2518 = vmatmul.mubr.msk.f32.gmra.mrb[10].mxu0 %vm350_vm0, %v337_v21  ;;  %1229 = vmatprep.subr.bf16.mxu0 %v2429_v55  ;;  %v818_v21 = vld [vmem:[#allocation3 + $0xc8] sm:$0xff] }
  0x54   : > { %2520 = vmatprep.mubr.msk.f32.mxu0 %vm350_vm0, %v338_v22  ;;  %v822_v22 = vld [vmem:[#allocation3 + $0xe8] sm:$0xff] }
  0x55   : > { %v2415_v29 = vcombine.high %v818_v21, %v822_v22  ;;  %v2414_v36 = vcombine.low %v818_v21, %v822_v22 }
  0x56   : > { %1230 = vmatpush1.bf16.msra.mxu0 %v2428_v58 }
  0x57   : > { %2521 = vmatmul.mubr.msk.f32.gmra.mrb[12].mxu0 %vm350_vm0, %v339_v23  ;;  %1231 = vmatprep.subr.bf16.mxu0 %v2437_v59  ;;  %v2439_v59 = vcombine.high %v842_v51, %v846_v52 }
  0x58   : > { %2523 = vmatprep.mubr.msk.f32.mxu0 %vm350_vm0, %v340_v24 }
  0x5a   : > { %1232 = vmatpush1.bf16.msra.mxu0 %v2436_v60 }
  0x5b   : > { %2524 = vmatmul.mubr.msk.f32.gmra.mrb[14].mxu0 %vm350_vm0, %v341_v25 }
 0x112   : > { %v2504_v62 = vpop.f32.mrb[0].mxu0 }
 0x113   : > { %v471_v63 = vadd.f32 %v2504_v62, %v2980_v61  ;;  %v465_v0 = vpop.f32.mrb[1].mxu0 }
 0x114   : > { %v466_v1 = vadd.f32 %v2980_v61, %v465_v0 }
 0x115   : > { %v545_v6 = vmax.f32 %v471_v63, 0.0 }
 0x116   : > { %v544_v4 = vmax.f32 %v466_v1, 0.0  ;;  %v2507_v5 = vpop.f32.mrb[2].mxu0  ;;  %v2438_v1 = vcombine.low %v842_v51, %v846_v52 }
 0x117   : > { %v481_v7 = vadd.f32 %v2507_v5, %v2980_v61  ;;  %v475_v8 = vpop.f32.mrb[3].mxu0 }
 0x118   : > { %v476_v10 = vadd.f32 %v2980_v61, %v475_v8  ;;  %2542 = vmatprep.mubr.msk.f32.mxu1 %vm575_vm1, %v544_v4  ;;  %v853_v8 = vld [vmem:[#allocation3 + $0x1e0] sm:$0xff] }
 0x119   : > { %v547_v13 = vmax.f32 %v481_v7, 0.0  ;;  %2543 = vmatmul.mubr.msk.f32.vlgmr.msra.gmra.mrb[0].mxu1 %vm575_vm1, %v545_v6  ;;  %v849_v7 = vld [vmem:[#allocation3 + $0x1c0] sm:$0xff] }
 0x11a   : > { %v546_v14 = vmax.f32 %v476_v10, 0.0  ;;  %v2510_v15 = vpop.f32.mrb[4].mxu0  ;;  %1333 = vmatpush1.bf16.msra.mxu1 %v2390_v37  ;;  %v2445_v10 = vcombine.high %v849_v7, %v853_v8  ;;  %v2444_v12 = vcombine.low %v849_v7, %v853_v8 }
 0x11b   : > { %v491_v17 = vadd.f32 %v2510_v15, %v2980_v61  ;;  %v485_v18 = vpop.f32.mrb[5].mxu0  ;;  %1334 = vmatprep.subr.bf16.mxu1 %v2399_v9  ;;  %v850_v9 = vld [vmem:[#allocation3 + $0x1c8] sm:$0xff]  ;;  %v795_v15 = vld [vmem:[#allocation3 + $0x10] sm:$0xff] }
 0x11c   : > { %2545 = vmatprep.mubr.msk.f32.mxu1 %vm575_vm1, %v546_v14  ;;  %v486_v20 = vadd.f32 %v2980_v61, %v485_v18  ;;  %v2447_v14 = vcombine.high %v850_v9, %v854_v11  ;;  %1233 = vmatprep.subr.bf16.mxu0 %v2445_v10 }
 0x11d   : > { %2546 = vmatmul.mubr.msk.f32.gmra.mrb[2].mxu1 %vm575_vm1, %v547_v13  ;;  %v549_v23 = vmax.f32 %v491_v17, 0.0  ;;  %v2446_v13 = vcombine.low %v850_v9, %v854_v11  ;;  %1234 = vmatpush1.bf16.msra.mxu0 %v2444_v12  ;;  %v796_v17 = vld [vmem:[#allocation3 + $0x18] sm:$0xff]  ;;  %v827_v9 = vld [vmem:[#allocation3 + $0x110] sm:$0xff] }
 0x11e   : > { %v548_v24 = vmax.f32 %v486_v20, 0.0  ;;  %v2513_v25 = vpop.f32.mrb[6].mxu0  ;;  %1335 = vmatpush1.bf16.msra.mxu1 %v2398_v16  ;;  %v799_v16 = vld [vmem:[#allocation3 + $0x30] sm:$0xff]  ;;  %v800_v20 = vld [vmem:[#allocation3 + $0x38] sm:$0xff] }
 0x11f   : > { %v501_v27 = vadd.f32 %v2513_v25, %v2980_v61  ;;  %v495_v28 = vpop.f32.mrb[7].mxu0  ;;  %1336 = vmatprep.subr.bf16.mxu1 %v2407_v19  ;;  %v2392_v18 = vcombine.low %v795_v15, %v799_v16  ;;  %v2393_v19 = vcombine.high %v795_v15, %v799_v16  ;;  %v2394_v21 = vcombine.low %v796_v17, %v800_v20  ;;  %v831_v12 = vld [vmem:[#allocation3 + $0x130] sm:$0xff] }
 0x120   : > { %2548 = vmatprep.mubr.msk.f32.mxu1 %vm575_vm1, %v548_v24  ;;  %v496_v30 = vadd.f32 %v2980_v61, %v495_v28  ;;  %v2395_v22 = vcombine.high %v796_v17, %v800_v20 }
 0x121   : > { %2549 = vmatmul.mubr.msk.f32.gmra.mrb[4].mxu1 %vm575_vm1, %v549_v23  ;;  %v551_v33 = vmax.f32 %v501_v27, 0.0  ;;  %1445 = vmatprep.subr.bf16.mxu0 %v2393_v19  ;;  %v3019_v23 = vld [vmem:[%s3210_s4] ss:$0 sm:$0xff] }
 0x122   : > { %v550_v34 = vmax.f32 %v496_v30, 0.0  ;;  %v2516_v35 = vpop.f32.mrb[8].mxu0  ;;  %1337 = vmatpush1.bf16.msra.mxu1 %v2406_v26 }
 0x123   : > { %v511_v37 = vadd.f32 %v2516_v35, %v2980_v61  ;;  %v505_v38 = vpop.f32.mrb[9].mxu0  ;;  %1338 = vmatprep.subr.bf16.mxu1 %v2415_v29  ;;  %v803_v29 = vld [vmem:[#allocation3 + $0x50] sm:$0xff] }
 0x124   : > { %2551 = vmatprep.mubr.msk.f32.mxu1 %vm575_vm1, %v550_v34  ;;  %v506_v40 = vadd.f32 %v2980_v61, %v505_v38  ;;  %v808_v34 = vld [vmem:[#allocation3 + $0x78] sm:$0xff]  ;;  %v2401_v42 = vcombine.high %v803_v29, %v807_v32 }
 0x125   : > { %2552 = vmatmul.mubr.msk.f32.gmra.mrb[6].mxu1 %vm575_vm1, %v551_v33  ;;  %v553_v43 = vmax.f32 %v511_v37, 0.0  ;;  %v804_v33 = vld [vmem:[#allocation3 + $0x58] sm:$0xff] }
 0x126   : > { %v552_v44 = vmax.f32 %v506_v40, 0.0  ;;  %v2519_v45 = vpop.f32.mrb[10].mxu0  ;;  %1339 = vmatpush1.bf16.msra.mxu1 %v2414_v36  ;;  %v815_v40 = vld [vmem:[#allocation3 + $0xb0] sm:$0xff]  ;;  %v2402_v51 = vcombine.low %v804_v33, %v808_v34 }
 0x127   : > { %v521_v47 = vadd.f32 %v2519_v45, %v2980_v61  ;;  %v515_v48 = vpop.f32.mrb[11].mxu0  ;;  %1340 = vmatprep.subr.bf16.mxu1 %v2423_v39  ;;  %v811_v39 = vld [vmem:[#allocation3 + $0x90] sm:$0xff]  ;;  %v816_v45 = vld [vmem:[#allocation3 + $0xb8] sm:$0xff] }
 0x128   : > { %2554 = vmatprep.mubr.msk.f32.mxu1 %vm575_vm1, %v552_v44  ;;  %v516_v50 = vadd.f32 %v2980_v61, %v515_v48  ;;  %v812_v44 = vld [vmem:[#allocation3 + $0x98] sm:$0xff]  ;;  %v2400_v48 = vcombine.low %v803_v29, %v807_v32  ;;  %v2409_v52 = vcombine.high %v811_v39, %v815_v40 }
 0x129   : > { %2555 = vmatmul.mubr.msk.f32.gmra.mrb[8].mxu1 %vm575_vm1, %v553_v43  ;;  %v555_v53 = vmax.f32 %v521_v47, 0.0  ;;  %v2403_v43 = vcombine.high %v804_v33, %v808_v34  ;;  %v836_v29 = vld [vmem:[#allocation3 + $0x158] sm:$0xff]  ;;  %v2424_v33 = vcombine.low %v827_v9, %v831_v12 }
 0x12a   : > { %v554_v54 = vmax.f32 %v516_v50, 0.0  ;;  %v2522_v55 = vpop.f32.mrb[12].mxu0  ;;  %1341 = vmatpush1.bf16.msra.mxu1 %v2422_v46 }
 0x12b   : > { %v531_v57 = vadd.f32 %v2522_v55, %v2980_v61  ;;  %v525_v58 = vpop.f32.mrb[13].mxu0  ;;  %1342 = vmatprep.subr.bf16.mxu1 %v2431_v49  ;;  %v2411_v55 = vcombine.high %v812_v44, %v816_v45 }
 0x12c   : > { %2557 = vmatprep.mubr.msk.f32.mxu1 %vm575_vm1, %v554_v54  ;;  %v526_v60 = vadd.f32 %v2980_v61, %v525_v58 }
 0x12d   : > { %2558 = vmatmul.mubr.msk.f32.gmra.mrb[10].mxu1 %vm575_vm1, %v555_v53  ;;  %v557_v62 = vmax.f32 %v531_v57, 0.0  ;;  %v819_v57 = vld [vmem:[#allocation3 + $0xd0] sm:$0xff] }
 0x12e   : > { %v556_v63 = vmax.f32 %v526_v60, 0.0  ;;  %v2525_v0 = vpop.f32.mrb[14].mxu0  ;;  %1343 = vmatpush1.bf16.msra.mxu1 %v2430_v56  ;;  %v823_v60 = vld [vmem:[#allocation3 + $0xf0] sm:$0xff] }
 0x12f   : > { %v541_v2 = vadd.f32 %v2525_v0, %v2980_v61  ;;  %v535_v3 = vpop.f32.mrb[15].mxu0  ;;  %1344 = vmatprep.subr.bf16.mxu1 %v2439_v59  ;;  %v2417_v7 = vcombine.high %v819_v57, %v823_v60  ;;  %v2416_v17 = vcombine.low %v819_v57, %v823_v60  ;;  %v851_v57 = vld [vmem:[#allocation3 + $0x1d0] sm:$0xff] }
 0x130   : > { %2560 = vmatprep.mubr.msk.f32.mxu1 %vm575_vm1, %v556_v63  ;;  %v536_v4 = vadd.f32 %v2980_v61, %v535_v3  ;;  %v2767_v61 = vmov 0   ;;  %v824_v63 = vld [vmem:[#allocation3 + $0xf8] sm:$0xff]  ;;  %v855_v60 = vld [vmem:[#allocation3 + $0x1f0] sm:$0xff] }
 0x131   : > { %2561 = vmatmul.mubr.msk.f32.gmra.mrb[12].mxu1 %vm575_vm1, %v557_v62  ;;  %v559_v5 = vmax.f32 %v541_v2, 0.0  ;;  %1251 = vmatprep.mubr.bf16.mxu0 %v2767_v61  ;;  %v820_v62 = vld [vmem:[#allocation3 + $0xd8] sm:$0xff]  ;;  %v2408_v2 = vcombine.low %v811_v39, %v815_v40 }
 0x132   : > { %v558_v6 = vmax.f32 %v536_v4, 0.0  ;;  %1345 = vmatpush1.bf16.msra.mxu1 %v2438_v1  ;;  %v2419_v8 = vcombine.high %v820_v62, %v824_v63  ;;  %v2418_v20 = vcombine.low %v820_v62, %v824_v63  ;;  %v852_v62 = vld [vmem:[#allocation3 + $0x1d8] sm:$0xff] }
 0x133   : > { %1346 = vmatprep.subr.bf16.mxu1 %v2447_v14  ;;  %v832_v14 = vld [vmem:[#allocation3 + $0x138] sm:$0xff] }
 0x134   : > { %2563 = vmatprep.mubr.msk.f32.mxu1 %vm575_vm1, %v558_v6  ;;  %v856_v63 = vld [vmem:[#allocation3 + $0x1f8] sm:$0xff] }
 0x135   : > { %2564 = vmatmul.mubr.msk.f32.gmra.mrb[14].mxu1 %vm575_vm1, %v559_v5  ;;  %v2410_v5 = vcombine.low %v812_v44, %v816_v45  ;;  %v847_v44 = vld [vmem:[#allocation3 + $0x1b0] sm:$0xff]  ;;  %v844_v45 = vld [vmem:[#allocation3 + $0x198] sm:$0xff] }
 0x136   : > { %1347 = vmatpush1.bf16.msra.mxu1 %v2446_v13  ;;  %1364 = vmatprep.mubr.bf16.mxu1 %v2767_v61  ;;  %v828_v13 = vld [vmem:[#allocation3 + $0x118] sm:$0xff] }
 0x137   : > { %1558 = vmatprep.subr.bf16.mxu1 %v2395_v22  ;;  %v2425_v22 = vcombine.high %v827_v9, %v831_v12  ;;  %v2451_v9 = vcombine.high %v852_v62, %v856_v63  ;;  %v2448_v12 = vcombine.low %v851_v57, %v855_v60 }
 0x1ec   : > { %v2544_v24 = vpop.f32.mrb[0].mxu1 }
 0x1ed   : > { %v696_v25 = vadd.f32 %v2544_v24, %v3019_v23  ;;  %v690_v26 = vpop.f32.mrb[1].mxu1  ;;  %v2427_v24 = vcombine.high %v828_v13, %v832_v14 }
 0x1ee   : > { %v691_v27 = vadd.f32 %v3019_v23, %v690_v26 }
 0x1ef   : > { %v770_v28 = vmax.f32 %v696_v25, 0.0  ;;  %v835_v25 = vld [vmem:[#allocation3 + $0x150] sm:$0xff] }
 0x1f0   : > { %v769_v30 = vmax.f32 %v691_v27, 0.0  ;;  %v2547_v31 = vpop.f32.mrb[2].mxu1 }
 0x1f1   : > { %v706_v35 = vadd.f32 %v2547_v31, %v3019_v23  ;;  %v700_v36 = vpop.f32.mrb[3].mxu1 }
 0x1f2   : > { %v3024_v37 = vpack.c.bf16 %v770_v28, %v769_v30  ;;  %v701_v38 = vadd.f32 %v3019_v23, %v700_v36  ;;  %v839_v28 = vld [vmem:[#allocation3 + $0x170] sm:$0xff]  ;;  %v840_v30 = vld [vmem:[#allocation3 + $0x178] sm:$0xff]  ;;  %v2426_v36 = vcombine.low %v828_v13, %v832_v14  ;;  %v3116_v14 = vld [vmem:[%s3212_s6] sm:$0xff] }
 0x1f3   : > { %v772_v41 = vmax.f32 %v706_v35, 0.0  ;;  %v2433_v39 = vcombine.high %v835_v25, %v839_v28  ;;  %v2435_v40 = vcombine.high %v836_v29, %v840_v30 }
 0x1f4   : > { %v771_v46 = vmax.f32 %v701_v38, 0.0  ;;  %1252 = vmatmul.mubr.bf16.vlgmr.msra.gmra.mrb[16].mxu0 %v3024_v37  ;;  %1365 = vmatmul.mubr.bf16.vlgmr.msra.gmra.mrb[16].mxu1 %v3024_v37  ;;  %v2550_v47 = vpop.f32.mrb[4].mxu1 }
 0x1f5   : > { %1446 = vmatpush1.bf16.msra.mxu0 %v2392_v18  ;;  %1559 = vmatpush1.bf16.msra.mxu1 %v2394_v21  ;;  %v716_v49 = vadd.f32 %v2550_v47, %v3019_v23  ;;  %v710_v50 = vpop.f32.mrb[5].mxu1 }
 0x1f6   : > { %v3030_v53 = vpack.c.bf16 %v772_v41, %v771_v46  ;;  %v711_v54 = vadd.f32 %v3019_v23, %v710_v50  ;;  %1261 = vmatprep.mubr.bf16.mxu0 %v2767_v61  ;;  %1374 = vmatprep.mubr.bf16.mxu1 %v2767_v61  ;;  %v843_v41 = vld [vmem:[#allocation3 + $0x190] sm:$0xff]  ;;  %v848_v46 = vld [vmem:[#allocation3 + $0x1b8] sm:$0xff] }
 0x1f7   : > { %v774_v56 = vmax.f32 %v716_v49, 0.0  ;;  %1447 = vmatprep.subr.bf16.mxu0 %v2401_v42  ;;  %1560 = vmatprep.subr.bf16.mxu1 %v2403_v43  ;;  %v2432_v49 = vcombine.low %v835_v25, %v839_v28 }
 0x1f8   : > { %v773_v58 = vmax.f32 %v711_v54, 0.0  ;;  %v2553_v59 = vpop.f32.mrb[6].mxu1 }
 0x1f9   : > { %1448 = vmatpush1.bf16.msra.mxu0 %v2400_v48  ;;  %1561 = vmatpush1.bf16.msra.mxu1 %v2402_v51  ;;  %v726_v0 = vadd.f32 %v2553_v59, %v3019_v23  ;;  %v720_v1 = vpop.f32.mrb[7].mxu1 }
 0x1fa   : > { %v3036_v3 = vpack.c.bf16 %v774_v56, %v773_v58  ;;  %v721_v4 = vadd.f32 %v3019_v23, %v720_v1  ;;  %1449 = vmatprep.subr.bf16.mxu0 %v2409_v52  ;;  %1562 = vmatprep.subr.bf16.mxu1 %v2411_v55  ;;  %v2434_v52 = vcombine.low %v836_v29, %v840_v30 }
 0x1fb   : > { %v776_v6 = vmax.f32 %v726_v0, 0.0  ;;  %v2441_v55 = vcombine.high %v843_v41, %v847_v44  ;;  %v2443_v56 = vcombine.high %v844_v45, %v848_v46 }
 0x1fc   : > { %1262 = vmatmul.mubr.bf16.gmra.mrb[20].mxu0 %v3030_v53  ;;  %1375 = vmatmul.mubr.bf16.gmra.mrb[20].mxu1 %v3030_v53  ;;  %v775_v10 = vmax.f32 %v721_v4, 0.0  ;;  %v2556_v11 = vpop.f32.mrb[8].mxu1 }
 0x1fd   : > { %1271 = vmatprep.mubr.bf16.mxu0 %v2767_v61  ;;  %1384 = vmatprep.mubr.bf16.mxu1 %v2767_v61  ;;  %v736_v15 = vadd.f32 %v2556_v11, %v3019_v23  ;;  %v730_v16 = vpop.f32.mrb[9].mxu1 }
 0x1fe   : > { %v3044_v18 = vpack.c.bf16 %v776_v6, %v775_v10  ;;  %1450 = vmatpush1.bf16.msra.mxu0 %v2408_v2  ;;  %1563 = vmatpush1.bf16.msra.mxu1 %v2410_v5  ;;  %v731_v19 = vadd.f32 %v3019_v23, %v730_v16  ;;  %v2440_v2 = vcombine.low %v843_v41, %v847_v44 }
 0x1ff   : > { %v778_v21 = vmax.f32 %v736_v15, 0.0  ;;  %1451 = vmatprep.subr.bf16.mxu0 %v2417_v7  ;;  %1564 = vmatprep.subr.bf16.mxu1 %v2419_v8  ;;  %v2442_v6 = vcombine.low %v844_v45, %v848_v46  ;;  %v2449_v8 = vcombine.high %v851_v57, %v855_v60 }
 0x200   : > { %v777_v26 = vmax.f32 %v731_v19, 0.0  ;;  %v2559_v27 = vpop.f32.mrb[10].mxu1 }
 0x201   : > { %v746_v31 = vadd.f32 %v2559_v27, %v3019_v23  ;;  %v740_v32 = vpop.f32.mrb[11].mxu1 }
 0x202   : > { %v3048_v34 = vpack.c.bf16 %v778_v21, %v777_v26  ;;  %1452 = vmatpush1.bf16.msra.mxu0 %v2416_v17  ;;  %1565 = vmatpush1.bf16.msra.mxu1 %v2418_v20  ;;  %v741_v35 = vadd.f32 %v3019_v23, %v740_v32 }
 0x203   : > { %v780_v38 = vmax.f32 %v746_v31, 0.0  ;;  %1453 = vmatprep.subr.bf16.mxu0 %v2425_v22  ;;  %1566 = vmatprep.subr.bf16.mxu1 %v2427_v24 }
 0x204   : > { %1272 = vmatmul.mubr.bf16.gmra.mrb[24].mxu0 %v3036_v3  ;;  %1385 = vmatmul.mubr.bf16.gmra.mrb[24].mxu1 %v3036_v3  ;;  %v779_v42 = vmax.f32 %v741_v35, 0.0  ;;  %v2562_v43 = vpop.f32.mrb[12].mxu1 }
 0x205   : > { %1281 = vmatprep.mubr.bf16.mxu0 %v2767_v61  ;;  %1394 = vmatprep.mubr.bf16.mxu1 %v2767_v61  ;;  %v756_v47 = vadd.f32 %v2562_v43, %v3019_v23  ;;  %v750_v48 = vpop.f32.mrb[13].mxu1 }
 0x206   : > { %v3056_v50 = vpack.c.bf16 %v780_v38, %v779_v42  ;;  %1454 = vmatpush1.bf16.msra.mxu0 %v2424_v33  ;;  %1567 = vmatpush1.bf16.msra.mxu1 %v2426_v36  ;;  %v751_v51 = vadd.f32 %v3019_v23, %v750_v48 }
 0x207   : > { %v782_v54 = vmax.f32 %v756_v47, 0.0  ;;  %1455 = vmatprep.subr.bf16.mxu0 %v2433_v39  ;;  %1568 = vmatprep.subr.bf16.mxu1 %v2435_v40 }
 0x208   : > { %v781_v58 = vmax.f32 %v751_v51, 0.0  ;;  %v2565_v59 = vpop.f32.mrb[14].mxu1 }
 0x209   : > { %v766_v0 = vadd.f32 %v2565_v59, %v3019_v23  ;;  %v760_v1 = vpop.f32.mrb[15].mxu1 }
 0x20a   : > { %v3060_v4 = vpack.c.bf16 %v782_v54, %v781_v58  ;;  %1456 = vmatpush1.bf16.msra.mxu0 %v2432_v49  ;;  %1569 = vmatpush1.bf16.msra.mxu1 %v2434_v52  ;;  %v761_v5 = vadd.f32 %v3019_v23, %v760_v1  ;;  %v2450_v23 = vcombine.low %v852_v62, %v856_v63 }
 0x20b   : > { %v784_v7 = vmax.f32 %v766_v0, 0.0  ;;  %1457 = vmatprep.subr.bf16.mxu0 %v2441_v55  ;;  %1570 = vmatprep.subr.bf16.mxu1 %v2443_v56 }
 0x20c   : > { %1282 = vmatmul.mubr.bf16.gmra.mrb[28].mxu0 %v3044_v18  ;;  %1395 = vmatmul.mubr.bf16.gmra.mrb[28].mxu1 %v3044_v18  ;;  %v783_v10 = vmax.f32 %v761_v5, 0.0 }
 0x20d   : > { %1291 = vmatprep.mubr.bf16.mxu0 %v2767_v61  ;;  %1404 = vmatprep.mubr.bf16.mxu1 %v2767_v61 }
 0x20e   : > { %v792_v11 = vpack.c.bf16 %v784_v7, %v783_v10  ;;  %1458 = vmatpush1.bf16.msra.mxu0 %v2440_v2  ;;  %1571 = vmatpush1.bf16.msra.mxu1 %v2442_v6 }
 0x20f   : > { %1459 = vmatprep.subr.bf16.mxu0 %v2449_v8  ;;  %1572 = vmatprep.subr.bf16.mxu1 %v2451_v9 }
 0x212   : > { %1460 = vmatpush1.bf16.msra.mxu0 %v2448_v12  ;;  %1573 = vmatpush1.bf16.msra.mxu1 %v2450_v23 }
 0x214   : > { %1292 = vmatmul.mubr.bf16.gmra.mrb[32].mxu0 %v3048_v34  ;;  %1405 = vmatmul.mubr.bf16.gmra.mrb[32].mxu1 %v3048_v34 }
 0x215   : > { %1301 = vmatprep.mubr.bf16.mxu0 %v2767_v61  ;;  %1414 = vmatprep.mubr.bf16.mxu1 %v2767_v61 }
 0x21c   : > { %1302 = vmatmul.mubr.bf16.gmra.mrb[36].mxu0 %v3056_v50  ;;  %1415 = vmatmul.mubr.bf16.gmra.mrb[36].mxu1 %v3056_v50 }
 0x21d   : > { %1311 = vmatprep.mubr.bf16.mxu0 %v2767_v61  ;;  %1424 = vmatprep.mubr.bf16.mxu1 %v2767_v61 }
 0x224   : > { %1312 = vmatmul.mubr.bf16.gmra.mrb[40].mxu0 %v3060_v4  ;;  %1425 = vmatmul.mubr.bf16.gmra.mrb[40].mxu1 %v3060_v4 }
 0x225   : > { %1321 = vmatprep.mubr.bf16.mxu0 %v2767_v61  ;;  %1434 = vmatprep.mubr.bf16.mxu1 %v2767_v61 }
 0x22c   : > { %1322 = vmatmul.mubr.bf16.gmra.mrb[44].mxu0 %v792_v11  ;;  %1435 = vmatmul.mubr.bf16.gmra.mrb[44].mxu1 %v792_v11 }
 0x22d   : > { %1477 = vmatprep.mubr.bf16.mxu0 %v2767_v61  ;;  %1590 = vmatprep.mubr.bf16.mxu1 %v2767_v61 }
 0x234   : > { %1478 = vmatmul.mubr.bf16.vlgmr.msra.gmra.mrb[48].mxu0 %v3024_v37  ;;  %1591 = vmatmul.mubr.bf16.vlgmr.msra.gmra.mrb[48].mxu1 %v3024_v37  ;;  %v859_v37 = vlaneseq }
 0x235   : > { %1487 = vmatprep.mubr.bf16.mxu0 %v2767_v61  ;;  %1600 = vmatprep.mubr.bf16.mxu1 %v2767_v61 }
 0x23c   : > { %1488 = vmatmul.mubr.bf16.gmra.mrb[52].mxu0 %v3030_v53  ;;  %1601 = vmatmul.mubr.bf16.gmra.mrb[52].mxu1 %v3030_v53  ;;  %v3109_v53 = vshrl.u32 %v859_v37, 7 }
 0x23d   : > { %1497 = vmatprep.mubr.bf16.mxu0 %v2767_v61  ;;  %1610 = vmatprep.mubr.bf16.mxu1 %v2767_v61 }
 0x23e   : > { %v869_v13 = vsub.s32 2, %v3109_v53  ;;  %v865_v15 = vsub.s32 1, %v3109_v53  ;;  %v873_v16 = vsub.s32 3, %v3109_v53 }
 0x240   : > { %v870_v17 = vrot.slane %v3116_v14, %v869_v13  ;;  %v874_v19 = vrot.slane %v3116_v14, %v873_v16 }
 0x244   : > { %1498 = vmatmul.mubr.bf16.gmra.mrb[56].mxu0 %v3036_v3  ;;  %1611 = vmatmul.mubr.bf16.gmra.mrb[56].mxu1 %v3036_v3  ;;  %v861_v3 = vsub.s32 0, %v3109_v53 }
 0x245   : > { %1507 = vmatprep.mubr.bf16.mxu0 %v2767_v61  ;;  %1620 = vmatprep.mubr.bf16.mxu1 %v2767_v61 }
 0x24c   : > { %1508 = vmatmul.mubr.bf16.gmra.mrb[60].mxu0 %v3044_v18  ;;  %1621 = vmatmul.mubr.bf16.gmra.mrb[60].mxu1 %v3044_v18  ;;  %v866_v18 = vrot.slane %v3116_v14, %v865_v15 }
 0x24d   : > { %1517 = vmatprep.mubr.bf16.mxu0 %v2767_v61  ;;  %1630 = vmatprep.mubr.bf16.mxu1 %v2767_v61 }
 0x254   : > { %1518 = vmatmul.mubr.bf16.gmra.mrb[64].mxu0 %v3048_v34  ;;  %1631 = vmatmul.mubr.bf16.gmra.mrb[64].mxu1 %v3048_v34 }
 0x255   : > { %1527 = vmatprep.mubr.bf16.mxu0 %v2767_v61  ;;  %1640 = vmatprep.mubr.bf16.mxu1 %v2767_v61 }
 0x25c   : > { %1528 = vmatmul.mubr.bf16.gmra.mrb[68].mxu0 %v3056_v50  ;;  %1641 = vmatmul.mubr.bf16.gmra.mrb[68].mxu1 %v3056_v50 }
 0x25d   : > { %1537 = vmatprep.mubr.bf16.mxu0 %v2767_v61  ;;  %1650 = vmatprep.mubr.bf16.mxu1 %v2767_v61 }
 0x264   : > { %1538 = vmatmul.mubr.bf16.gmra.mrb[72].mxu0 %v3060_v4  ;;  %1651 = vmatmul.mubr.bf16.gmra.mrb[72].mxu1 %v3060_v4 }
 0x265   : > { %1547 = vmatprep.mubr.bf16.mxu0 %v2767_v61  ;;  %1660 = vmatprep.mubr.bf16.mxu1 %v2767_v61  ;;  %v862_v61 = vrot.slane %v3116_v14, %v861_v3 }
 0x26c   : > { %1548 = vmatmul.mubr.bf16.gmra.mrb[76].mxu0 %v792_v11  ;;  %1661 = vmatmul.mubr.bf16.gmra.mrb[76].mxu1 %v792_v11 }
 0x2c7   : > { %v1253_v20 = vpop.f32.mrb[16].mxu0  ;;  %v1366_v21 = vpop.f32.mrb[16].mxu1 }
 0x2c8   : > { %v1254_v22 = vadd.f32 %v1253_v20, %v862_v61  ;;  %v1367_v24 = vadd.f32 %v1366_v21, %v870_v17  ;;  %v1255_v25 = vpop.f32.mrb[17].mxu0  ;;  %v1368_v26 = vpop.f32.mrb[17].mxu1 }
 0x2c9   : > { %v1256_v27 = vadd.f32 %v1255_v25, %v866_v18  ;;  %v1369_v28 = vadd.f32 %v1368_v26, %v874_v19  ;;  %v1257_v29 = vpop.f32.mrb[18].mxu0  ;;  %v1370_v30 = vpop.f32.mrb[18].mxu1 }
 0x2ca   : > { %v1258_v31 = vadd.f32 %v1257_v29, %v862_v61  ;;  %v1371_v32 = vadd.f32 %v1370_v30, %v870_v17  ;;  %v1259_v33 = vpop.f32.mrb[19].mxu0  ;;  %v1372_v34 = vpop.f32.mrb[19].mxu1  ;;  %v1671_v38 = vmax.f32 %v1254_v22, 0.0  ;;  %v1673_v39 = vmax.f32 %v1367_v24, 0.0 }
 0x2cb   : > { %v1260_v35 = vadd.f32 %v1259_v33, %v866_v18  ;;  %v1373_v36 = vadd.f32 %v1372_v34, %v874_v19  ;;  %v1672_v42 = vmax.f32 %v1256_v27, 0.0  ;;  %v1674_v43 = vmax.f32 %v1369_v28, 0.0 }
 0x2cc   : > { %v1679_v40 = vmax.f32 %v1258_v31, 0.0  ;;  %v1681_v41 = vmax.f32 %v1371_v32, 0.0 }
 0x2cd   : > { %v1680_v44 = vmax.f32 %v1260_v35, 0.0  ;;  %v1682_v45 = vmax.f32 %v1373_v36, 0.0 }
 0x2ce   : > { %v2011_v46 = vmax.f32 %v1671_v38, %v1679_v40  ;;  %v2053_v47 = vmax.f32 %v1673_v39, %v1681_v41 }
 0x2cf   : > { %v2032_v48 = vmax.f32 %v1672_v42, %v1680_v44  ;;  %v2074_v49 = vmax.f32 %v1674_v43, %v1682_v45  ;;  %v1263_v50 = vpop.f32.mrb[20].mxu0  ;;  %v1376_v51 = vpop.f32.mrb[20].mxu1 }
 0x2d0   : > { %v2012_v52 = vmax.f32 %v2011_v46, 0.0  ;;  %v2054_v54 = vmax.f32 %v2053_v47, 0.0  ;;  %v1265_v55 = vpop.f32.mrb[21].mxu0  ;;  %v1378_v56 = vpop.f32.mrb[21].mxu1 }
 0x2d1   : > { %v2033_v57 = vmax.f32 %v2032_v48, 0.0  ;;  %v2075_v58 = vmax.f32 %v2074_v49, 0.0  ;;  %v1267_v59 = vpop.f32.mrb[22].mxu0  ;;  %v1380_v60 = vpop.f32.mrb[22].mxu1 }
 0x2d2   : > { %v2013_v62 = vmax.f32 %v2012_v52, 0.0  ;;  %v2055_v63 = vmax.f32 %v2054_v54, 0.0  ;;  %v1269_v0 = vpop.f32.mrb[23].mxu0  ;;  %v1382_v1 = vpop.f32.mrb[23].mxu1 }
 0x2d3   : > { %v2034_v2 = vmax.f32 %v2033_v57, 0.0  ;;  %v2076_v4 = vmax.f32 %v2075_v58, 0.0 }
 0x2d4   : > { %v2014_v5 = vmax.f32 %v2013_v62, 0.0  ;;  %v2056_v6 = vmax.f32 %v2055_v63, 0.0 }
 0x2d5   : > { %v2035_v7 = vmax.f32 %v2034_v2, 0.0  ;;  %v2077_v8 = vmax.f32 %v2076_v4, 0.0 }
 0x2d6   : > { %v2015_v9 = vmax.f32 %v2014_v5, 0.0  ;;  %v2057_v10 = vmax.f32 %v2056_v6, 0.0 }
 0x2d7   : > { %v2036_v11 = vmax.f32 %v2035_v7, 0.0  ;;  %v2078_v12 = vmax.f32 %v2077_v8, 0.0  ;;  %v1273_v23 = vpop.f32.mrb[24].mxu0  ;;  %v1386_v37 = vpop.f32.mrb[24].mxu1 }
 0x2d8   : > { %v2016_v3 = vmax.f32 %v2015_v9, 0.0  ;;  %v2058_v13 = vmax.f32 %v2057_v10, 0.0  ;;  %v1275_v15 = vpop.f32.mrb[25].mxu0  ;;  %v1388_v16 = vpop.f32.mrb[25].mxu1 }
 0x2d9   : > { %v2037_v61 = vmax.f32 %v2036_v11, 0.0  ;;  %v2079_v17 = vmax.f32 %v2078_v12, 0.0  ;;  %v1277_v18 = vpop.f32.mrb[26].mxu0  ;;  %v1390_v19 = vpop.f32.mrb[26].mxu1 }
 0x2da   : > { %v2017_v20 = vmax.f32 %v2016_v3, 0.0  ;;  %v2059_v21 = vmax.f32 %v2058_v13, 0.0  ;;  %v1279_v22 = vpop.f32.mrb[27].mxu0  ;;  %v1392_v24 = vpop.f32.mrb[27].mxu1 }
 0x2db   : > { %v2038_v25 = vmax.f32 %v2037_v61, 0.0  ;;  %v2080_v26 = vmax.f32 %v2079_v17, 0.0  ;;  %v2768_v22 = vmov 1966171168  }
 0x2dc   : > { %v2018_v27 = vmax.f32 %v2017_v20, 0.0  ;;  %v2060_v28 = vmax.f32 %v2059_v21, 0.0  ;;  %v2192_v24 = vunpack.c.l.s4 %v2768_v22 }
 0x2dd   : > { %v2039_v29 = vmax.f32 %v2038_v25, 0.0  ;;  %v2081_v30 = vmax.f32 %v2080_v26, 0.0 }
 0x2de   : > { %v2019_v31 = vmax.f32 %v2018_v27, 0.0  ;;  %v2061_v32 = vmax.f32 %v2060_v28, 0.0 }
 0x2df   : > { %v2040_v33 = vmax.f32 %v2039_v29, 0.0  ;;  %v2082_v34 = vmax.f32 %v2081_v30, 0.0  ;;  %v1283_v35 = vpop.f32.mrb[28].mxu0  ;;  %v1396_v36 = vpop.f32.mrb[28].mxu1 }
 0x2e0   : > { %v2020_v38 = vmax.f32 %v2019_v31, 0.0  ;;  %v2062_v39 = vmax.f32 %v2061_v32, 0.0  ;;  %v1285_v40 = vpop.f32.mrb[29].mxu0  ;;  %v1398_v41 = vpop.f32.mrb[29].mxu1 }
 0x2e1   : > { %v2041_v42 = vmax.f32 %v2040_v33, 0.0  ;;  %v2083_v43 = vmax.f32 %v2082_v34, 0.0  ;;  %v1287_v44 = vpop.f32.mrb[30].mxu0  ;;  %v1400_v45 = vpop.f32.mrb[30].mxu1  ;;  %v2193_v40 = vunpack.c.0.s8 %v2192_v24 }
 0x2e2   : > { %v2021_v46 = vmax.f32 %v2020_v38, 0.0  ;;  %v2063_v47 = vmax.f32 %v2062_v39, 0.0  ;;  %v1289_v48 = vpop.f32.mrb[31].mxu0  ;;  %v1402_v49 = vpop.f32.mrb[31].mxu1 }
 0x2e3   : > { %v2042_v50 = vmax.f32 %v2041_v42, 0.0  ;;  %v2084_v51 = vmax.f32 %v2083_v43, 0.0 }
 0x2e4   : > { %v2022_v52 = vmax.f32 %v2021_v46, 0.0  ;;  %v2064_v54 = vmax.f32 %v2063_v47, 0.0 }
 0x2e5   : > { %v2043_v55 = vmax.f32 %v2042_v50, 0.0  ;;  %v2085_v56 = vmax.f32 %v2084_v51, 0.0  ;;  %v3125_v51 = vsub.s32 %v2193_v40, %v3109_v53 }
 0x2e6   : > { %v2023_v57 = vmax.f32 %v2022_v52, 0.0  ;;  %v2065_v58 = vmax.f32 %v2064_v54, 0.0 }
 0x2e7   : > { %v2044_v59 = vmax.f32 %v2043_v55, 0.0  ;;  %v2086_v60 = vmax.f32 %v2085_v56, 0.0  ;;  %v1293_v62 = vpop.f32.mrb[32].mxu0  ;;  %v1406_v63 = vpop.f32.mrb[32].mxu1 }
 0x2e8   : > { %v2024_v0 = vmax.f32 %v2023_v57, 0.0  ;;  %v2066_v1 = vmax.f32 %v2065_v58, 0.0  ;;  %v1295_v2 = vpop.f32.mrb[33].mxu0  ;;  %v1408_v4 = vpop.f32.mrb[33].mxu1 }
 0x2e9   : > { %v2045_v5 = vmax.f32 %v2044_v59, 0.0  ;;  %v2087_v6 = vmax.f32 %v2086_v60, 0.0  ;;  %v1297_v7 = vpop.f32.mrb[34].mxu0  ;;  %v1410_v8 = vpop.f32.mrb[34].mxu1 }
 0x2ea   : > { %v2025_v9 = vmax.f32 %v2024_v0, 0.0  ;;  %v2067_v10 = vmax.f32 %v2066_v1, 0.0  ;;  %v1299_v11 = vpop.f32.mrb[35].mxu0  ;;  %v1412_v12 = vpop.f32.mrb[35].mxu1  ;;  %v885_v7 = vsub.s32 6, %v3109_v53 }
 0x2eb   : > { %v2046_v23 = vmax.f32 %v2045_v5, 0.0  ;;  %v2088_v37 = vmax.f32 %v2087_v6, 0.0  ;;  %v877_v6 = vsub.s32 4, %v3109_v53  ;;  %v889_v11 = vsub.s32 7, %v3109_v53 }
 0x2ec   : > { %v2026_v3 = vrot.slane %v2025_v9, 4  ;;  %v2068_v13 = vrot.slane %v2067_v10, 4 }
 0x2ed   : > { %v2047_v15 = vrot.slane %v2046_v23, 4  ;;  %v2089_v16 = vrot.slane %v2088_v37, 4 }
 0x2ee   : > { %v2027_v61 = vmax.f32 %v2025_v9, %v2026_v3  ;;  %v2069_v17 = vmax.f32 %v2067_v10, %v2068_v13  ;;  %v881_v10 = vsub.s32 5, %v3109_v53  ;;  %v886_v3 = vrot.slane %v3116_v14, %v885_v7 }
 0x2ef   : > { %v2048_v18 = vmax.f32 %v2046_v23, %v2047_v15  ;;  %v2090_v19 = vmax.f32 %v2088_v37, %v2089_v16  ;;  %v1303_v20 = vpop.f32.mrb[36].mxu0  ;;  %v1416_v21 = vpop.f32.mrb[36].mxu1  ;;  %v878_v37 = vrot.slane %v3116_v14, %v877_v6  ;;  %v890_v15 = vrot.slane %v3116_v14, %v889_v11 }
 0x2f0   : > { %v2028_v25 = vrot.slane %v2027_v61, 2  ;;  %v2070_v26 = vrot.slane %v2069_v17, 2  ;;  %v1305_v27 = vpop.f32.mrb[37].mxu0  ;;  %v1418_v28 = vpop.f32.mrb[37].mxu1  ;;  %v882_v13 = vrot.slane %v3116_v14, %v881_v10 }
 0x2f1   : > { %v2049_v29 = vrot.slane %v2048_v18, 2  ;;  %v2091_v30 = vrot.slane %v2090_v19, 2  ;;  %v1307_v31 = vpop.f32.mrb[38].mxu0  ;;  %v1420_v32 = vpop.f32.mrb[38].mxu1 }
 0x2f2   : > { %v2029_v33 = vmax.f32 %v2027_v61, %v2028_v25  ;;  %v2071_v34 = vmax.f32 %v2069_v17, %v2070_v26  ;;  %v1309_v35 = vpop.f32.mrb[39].mxu0  ;;  %v1422_v36 = vpop.f32.mrb[39].mxu1 }
 0x2f3   : > { %v2050_v38 = vmax.f32 %v2048_v18, %v2049_v29  ;;  %v2092_v39 = vmax.f32 %v2090_v19, %v2091_v30 }
 0x2f4   : > { %v2030_v41 = vrot.slane %v2029_v33, 1  ;;  %v2072_v42 = vrot.slane %v2071_v34, 1 }
 0x2f5   : > { %v2051_v43 = vrot.slane %v2050_v38, 1  ;;  %v2093_v44 = vrot.slane %v2092_v39, 1 }
 0x2f6   : > { %v2031_v45 = vmax.f32 %v2029_v33, %v2030_v41  ;;  %v2073_v46 = vmax.f32 %v2071_v34, %v2072_v42 }
 0x2f7   : > { %v2052_v47 = vmax.f32 %v2050_v38, %v2051_v43  ;;  %v2094_v48 = vmax.f32 %v2092_v39, %v2093_v44  ;;  %v1313_v49 = vpop.f32.mrb[40].mxu0  ;;  %v1426_v50 = vpop.f32.mrb[40].mxu1 }
 0x2f8   : > { %v1315_v52 = vpop.f32.mrb[41].mxu0  ;;  %v1428_v54 = vpop.f32.mrb[41].mxu1 }
 0x2f9   : > { %v2187_v55 = vcombine.low %v2031_v45, %v2052_v47  ;;  %v2188_v56 = vcombine.low %v2073_v46, %v2094_v48  ;;  %v1317_v57 = vpop.f32.mrb[42].mxu0  ;;  %v1430_v58 = vpop.f32.mrb[42].mxu1 }
 0x2fa   : > { %v1319_v59 = vpop.f32.mrb[43].mxu0  ;;  %v1432_v60 = vpop.f32.mrb[43].mxu1 }
 0x2fb   : > { %v3128_v62 = vrot.slane %v2187_v55, %v3125_v51  ;;  %v3131_v63 = vrot.slane %v2188_v56, %v3125_v51 }
 0x2fd   : > { %v2219_v0 = vcombine.low %v3128_v62, %v3131_v63 }
 0x2ff   : > { %v1323_v1 = vpop.f32.mrb[44].mxu0  ;;  %v1436_v2 = vpop.f32.mrb[44].mxu1 }
 0x300   : > { %v1325_v4 = vpop.f32.mrb[45].mxu0  ;;  %v1438_v5 = vpop.f32.mrb[45].mxu1 }
 0x301   : > { %v1327_v8 = vpop.f32.mrb[46].mxu0  ;;  %v1440_v9 = vpop.f32.mrb[46].mxu1 }
 0x302   : > { %v1329_v12 = vpop.f32.mrb[47].mxu0  ;;  %v1442_v23 = vpop.f32.mrb[47].mxu1 }
 0x307   : > { %v1479_v16 = vpop.f32.mrb[48].mxu0  ;;  %v1592_v61 = vpop.f32.mrb[48].mxu1 }
 0x308   : > { %v1480_v17 = vadd.f32 %v1479_v16, %v878_v37  ;;  %v1593_v18 = vadd.f32 %v1592_v61, %v886_v3  ;;  %v1481_v19 = vpop.f32.mrb[49].mxu0  ;;  %v1594_v20 = vpop.f32.mrb[49].mxu1 }
 0x309   : > { %v1482_v21 = vadd.f32 %v1481_v19, %v882_v13  ;;  %v1595_v22 = vadd.f32 %v1594_v20, %v890_v15  ;;  %v1483_v24 = vpop.f32.mrb[50].mxu0  ;;  %v1596_v53 = vpop.f32.mrb[50].mxu1 }
 0x30a   : > { %v1484_v25 = vadd.f32 %v1483_v24, %v878_v37  ;;  %v1597_v26 = vadd.f32 %v1596_v53, %v886_v3  ;;  %v1485_v27 = vpop.f32.mrb[51].mxu0  ;;  %v1598_v28 = vpop.f32.mrb[51].mxu1  ;;  %v1675_v31 = vmax.f32 %v1480_v17, 0.0  ;;  %v1677_v32 = vmax.f32 %v1593_v18, 0.0 }
 0x30b   : > { %v1486_v29 = vadd.f32 %v1485_v27, %v882_v13  ;;  %v1599_v30 = vadd.f32 %v1598_v28, %v890_v15  ;;  %v1676_v34 = vmax.f32 %v1482_v21, 0.0  ;;  %v1678_v35 = vmax.f32 %v1595_v22, 0.0 }
 0x30c   : > { %v1683_v33 = vmax.f32 %v1484_v25, 0.0  ;;  %v1685_v14 = vmax.f32 %v1597_v26, 0.0 }
 0x30d   : > { %v1684_v36 = vmax.f32 %v1486_v29, 0.0  ;;  %v1686_v38 = vmax.f32 %v1599_v30, 0.0 }
 0x30e   : > { %v2095_v39 = vmax.f32 %v1675_v31, %v1683_v33  ;;  %v2137_v40 = vmax.f32 %v1677_v32, %v1685_v14 }
 0x30f   : > { %v2116_v41 = vmax.f32 %v1676_v34, %v1684_v36  ;;  %v2158_v42 = vmax.f32 %v1678_v35, %v1686_v38  ;;  %v1489_v43 = vpop.f32.mrb[52].mxu0  ;;  %v1602_v44 = vpop.f32.mrb[52].mxu1 }
 0x310   : > { %v2096_v45 = vmax.f32 %v2095_v39, 0.0  ;;  %v2138_v46 = vmax.f32 %v2137_v40, 0.0  ;;  %v1491_v47 = vpop.f32.mrb[53].mxu0  ;;  %v1604_v48 = vpop.f32.mrb[53].mxu1 }
 0x311   : > { %v2117_v49 = vmax.f32 %v2116_v41, 0.0  ;;  %v2159_v50 = vmax.f32 %v2158_v42, 0.0  ;;  %v1493_v52 = vpop.f32.mrb[54].mxu0  ;;  %v1606_v54 = vpop.f32.mrb[54].mxu1 }
 0x312   : > { %v2097_v55 = vmax.f32 %v2096_v45, 0.0  ;;  %v2139_v56 = vmax.f32 %v2138_v46, 0.0  ;;  %v1495_v57 = vpop.f32.mrb[55].mxu0  ;;  %v1608_v58 = vpop.f32.mrb[55].mxu1 }
 0x313   : > { %v2118_v59 = vmax.f32 %v2117_v49, 0.0  ;;  %v2160_v60 = vmax.f32 %v2159_v50, 0.0 }
 0x314   : > { %v2098_v1 = vmax.f32 %v2097_v55, 0.0  ;;  %v2140_v2 = vmax.f32 %v2139_v56, 0.0 }
 0x315   : > { %v2119_v4 = vmax.f32 %v2118_v59, 0.0  ;;  %v2161_v5 = vmax.f32 %v2160_v60, 0.0 }
 0x316   : > { %v2099_v6 = vmax.f32 %v2098_v1, 0.0  ;;  %v2141_v7 = vmax.f32 %v2140_v2, 0.0 }
 0x317   : > { %v2120_v8 = vmax.f32 %v2119_v4, 0.0  ;;  %v2162_v9 = vmax.f32 %v2161_v5, 0.0  ;;  %v1499_v10 = vpop.f32.mrb[56].mxu0  ;;  %v1612_v11 = vpop.f32.mrb[56].mxu1 }
 0x318   : > { %v2100_v12 = vmax.f32 %v2099_v6, 0.0  ;;  %v2142_v23 = vmax.f32 %v2141_v7, 0.0  ;;  %v1501_v37 = vpop.f32.mrb[57].mxu0  ;;  %v1614_v3 = vpop.f32.mrb[57].mxu1 }
 0x319   : > { %v2121_v13 = vmax.f32 %v2120_v8, 0.0  ;;  %v2163_v15 = vmax.f32 %v2162_v9, 0.0  ;;  %v1503_v16 = vpop.f32.mrb[58].mxu0  ;;  %v1616_v61 = vpop.f32.mrb[58].mxu1 }
 0x31a   : > { %v2101_v17 = vmax.f32 %v2100_v12, 0.0  ;;  %v2143_v18 = vmax.f32 %v2142_v23, 0.0  ;;  %v1505_v19 = vpop.f32.mrb[59].mxu0  ;;  %v1618_v20 = vpop.f32.mrb[59].mxu1 }
 0x31b   : > { %v2122_v21 = vmax.f32 %v2121_v13, 0.0  ;;  %v2164_v22 = vmax.f32 %v2163_v15, 0.0 }
 0x31c   : > { %v2102_v24 = vmax.f32 %v2101_v17, 0.0  ;;  %v2144_v53 = vmax.f32 %v2143_v18, 0.0 }
 0x31d   : > { %v2123_v25 = vmax.f32 %v2122_v21, 0.0  ;;  %v2165_v26 = vmax.f32 %v2164_v22, 0.0 }
 0x31e   : > { %v2103_v27 = vmax.f32 %v2102_v24, 0.0  ;;  %v2145_v28 = vmax.f32 %v2144_v53, 0.0 }
 0x31f   : > { %v2124_v29 = vmax.f32 %v2123_v25, 0.0  ;;  %v2166_v30 = vmax.f32 %v2165_v26, 0.0  ;;  %v1509_v31 = vpop.f32.mrb[60].mxu0  ;;  %v1622_v32 = vpop.f32.mrb[60].mxu1 }
 0x320   : > { %v2104_v33 = vmax.f32 %v2103_v27, 0.0  ;;  %v2146_v14 = vmax.f32 %v2145_v28, 0.0  ;;  %v1511_v34 = vpop.f32.mrb[61].mxu0  ;;  %v1624_v35 = vpop.f32.mrb[61].mxu1 }
 0x321   : > { %v2125_v36 = vmax.f32 %v2124_v29, 0.0  ;;  %v2167_v38 = vmax.f32 %v2166_v30, 0.0  ;;  %v1513_v39 = vpop.f32.mrb[62].mxu0  ;;  %v1626_v40 = vpop.f32.mrb[62].mxu1 }
 0x322   : > { %v2105_v41 = vmax.f32 %v2104_v33, 0.0  ;;  %v2147_v42 = vmax.f32 %v2146_v14, 0.0  ;;  %v1515_v43 = vpop.f32.mrb[63].mxu0  ;;  %v1628_v44 = vpop.f32.mrb[63].mxu1 }
 0x323   : > { %v2126_v45 = vmax.f32 %v2125_v36, 0.0  ;;  %v2168_v46 = vmax.f32 %v2167_v38, 0.0 }
 0x324   : > { %v2106_v47 = vmax.f32 %v2105_v41, 0.0  ;;  %v2148_v48 = vmax.f32 %v2147_v42, 0.0 }
 0x325   : > { %v2127_v49 = vmax.f32 %v2126_v45, 0.0  ;;  %v2169_v50 = vmax.f32 %v2168_v46, 0.0 }
 0x326   : > { %v2107_v52 = vmax.f32 %v2106_v47, 0.0  ;;  %v2149_v54 = vmax.f32 %v2148_v48, 0.0 }
 0x327   : > { %v2128_v55 = vmax.f32 %v2127_v49, 0.0  ;;  %v2170_v56 = vmax.f32 %v2169_v50, 0.0  ;;  %v1519_v57 = vpop.f32.mrb[64].mxu0  ;;  %v1632_v58 = vpop.f32.mrb[64].mxu1 }
 0x328   : > { %v2108_v59 = vmax.f32 %v2107_v52, 0.0  ;;  %v2150_v60 = vmax.f32 %v2149_v54, 0.0  ;;  %v1521_v1 = vpop.f32.mrb[65].mxu0  ;;  %v1634_v2 = vpop.f32.mrb[65].mxu1 }
 0x329   : > { %v2129_v4 = vmax.f32 %v2128_v55, 0.0  ;;  %v2171_v5 = vmax.f32 %v2170_v56, 0.0  ;;  %v1523_v6 = vpop.f32.mrb[66].mxu0  ;;  %v1636_v7 = vpop.f32.mrb[66].mxu1 }
 0x32a   : > { %v2109_v8 = vmax.f32 %v2108_v59, 0.0  ;;  %v2151_v9 = vmax.f32 %v2150_v60, 0.0  ;;  %v1525_v10 = vpop.f32.mrb[67].mxu0  ;;  %v1638_v11 = vpop.f32.mrb[67].mxu1  ;;  %v2227_v60 = vrot.slane %v2219_v0, %v3125_v51 }
 0x32b   : > { %v2130_v12 = vmax.f32 %v2129_v4, 0.0  ;;  %v2172_v23 = vmax.f32 %v2171_v5, 0.0 }
 0x32c   : > { %v2110_v37 = vrot.slane %v2109_v8, 4  ;;  %v2152_v3 = vrot.slane %v2151_v9, 4 }
 0x32d   : > { %v2131_v13 = vrot.slane %v2130_v12, 4  ;;  %v2173_v15 = vrot.slane %v2172_v23, 4 }
 0x32e   : > { %v2111_v16 = vmax.f32 %v2109_v8, %v2110_v37  ;;  %v2153_v61 = vmax.f32 %v2151_v9, %v2152_v3 }
 0x32f   : > { %v2132_v17 = vmax.f32 %v2130_v12, %v2131_v13  ;;  %v2174_v18 = vmax.f32 %v2172_v23, %v2173_v15  ;;  %v1529_v19 = vpop.f32.mrb[68].mxu0  ;;  %v1642_v20 = vpop.f32.mrb[68].mxu1 }
 0x330   : > { %v2112_v21 = vrot.slane %v2111_v16, 2  ;;  %v2154_v22 = vrot.slane %v2153_v61, 2  ;;  %v1531_v24 = vpop.f32.mrb[69].mxu0  ;;  %v1644_v53 = vpop.f32.mrb[69].mxu1 }
 0x331   : > { %v2133_v25 = vrot.slane %v2132_v17, 2  ;;  %v2175_v26 = vrot.slane %v2174_v18, 2  ;;  %v1533_v27 = vpop.f32.mrb[70].mxu0  ;;  %v1646_v28 = vpop.f32.mrb[70].mxu1 }
 0x332   : > { %v2113_v29 = vmax.f32 %v2111_v16, %v2112_v21  ;;  %v2155_v30 = vmax.f32 %v2153_v61, %v2154_v22  ;;  %v1535_v31 = vpop.f32.mrb[71].mxu0  ;;  %v1648_v32 = vpop.f32.mrb[71].mxu1 }
 0x333   : > { %v2134_v33 = vmax.f32 %v2132_v17, %v2133_v25  ;;  %v2176_v14 = vmax.f32 %v2174_v18, %v2175_v26 }
 0x334   : > { %v2114_v34 = vrot.slane %v2113_v29, 1  ;;  %v2156_v35 = vrot.slane %v2155_v30, 1 }
 0x335   : > { %v2135_v36 = vrot.slane %v2134_v33, 1  ;;  %v2177_v38 = vrot.slane %v2176_v14, 1 }
 0x336   : > { %v2115_v39 = vmax.f32 %v2113_v29, %v2114_v34  ;;  %v2157_v40 = vmax.f32 %v2155_v30, %v2156_v35 }
 0x337   : > { %v2136_v41 = vmax.f32 %v2134_v33, %v2135_v36  ;;  %v2178_v42 = vmax.f32 %v2176_v14, %v2177_v38  ;;  %v1539_v43 = vpop.f32.mrb[72].mxu0  ;;  %v1652_v44 = vpop.f32.mrb[72].mxu1 }
 0x338   : > { %v1541_v45 = vpop.f32.mrb[73].mxu0  ;;  %v1654_v46 = vpop.f32.mrb[73].mxu1 }
 0x339   : > { %v2189_v47 = vcombine.low %v2115_v39, %v2136_v41  ;;  %v2190_v48 = vcombine.low %v2157_v40, %v2178_v42  ;;  %v1543_v49 = vpop.f32.mrb[74].mxu0  ;;  %v1656_v50 = vpop.f32.mrb[74].mxu1 }
 0x33a   : > { %v1545_v52 = vpop.f32.mrb[75].mxu0  ;;  %v1658_v54 = vpop.f32.mrb[75].mxu1 }
 0x33b   : > { %v2211_v55 = vrot.slane %v2189_v47, %v3125_v51  ;;  %v2218_v56 = vrot.slane %v2190_v48, %v3125_v51 }
 0x33d   : > { %v2220_v57 = vcombine.low %v2211_v55, %v2218_v56 }
 0x33f   : > { %v1549_v58 = vpop.f32.mrb[76].mxu0  ;;  %v1662_v59 = vpop.f32.mrb[76].mxu1  ;;  %v2234_v1 = vrot.slane %v2220_v57, %v3125_v51 }
 0x340   : > { %v1551_v2 = vpop.f32.mrb[77].mxu0  ;;  %v1664_v4 = vpop.f32.mrb[77].mxu1 }
 0x341   : > { %v1553_v5 = vpop.f32.mrb[78].mxu0  ;;  %v1666_v6 = vpop.f32.mrb[78].mxu1  ;;  %v2235_v7 = vcombine.low %v2227_v60, %v2234_v1 }
 0x342   : > { %v1555_v8 = vpop.f32.mrb[79].mxu0  ;;  %v1668_v9 = vpop.f32.mrb[79].mxu1 }
 0x343   : > { %v2237_v10 = vmax.f32 %v2235_v7, 0.0 }
 0x345   : > { %2243 = vst [vmem:[%s309_s16] sm:$0xff] %v2237_v10 }
 0x346   : > { %2693 = shalt.err (!%p2690_p6)
}
 0x347   : > { %s2694_s8 = scalar_lea.hbm %s3157_s10, 128  ;;  %s2698_s18 = scalar_lea.hbm %s3213_s7, 256 }
 0x348   : > { %p2695_p7 = scmp.ne.s32.totalorder %s3157_s10, %s2694_s8  ;;  %p2699_p0 = scmp.lt.u32.totalorder %s3157_s10, %s3213_s7 }
 0x349   : > { %p2700_p2 = scmp.lt.u32.totalorder %s2698_s18, %s2694_s8  ;;  %p2702_p8 = scmp.lt.u32.totalorder %s2694_s8, %s3157_s10 }
 0x34a   : > { %p2696_p9 = pnand %p2695_p7, %p3225_p10 }
 0x34b   : > { %p2701_p4 = por %p2700_p2, %p2699_p0 }
 0x34c   : > { %p2697_p12 = pneg %p2696_p9 }
 0x34d   : > { %p2703_p11 = por %p2702_p8, %p2701_p4 }
 0x34f   : > { %p2704_p13 = pnand %p2703_p11, %p2697_p12 }
 0x351   : > { %2707 = shalt.err (!%p2704_p13)
}
 0x352   : > { %2586 = dma.vmem_to_hbm [thread:$0]  (%p3225_p10), %s3159_s12, 128, %s3157_s10, %s2245_s27  }
 0x353 PF: > { %p2598_p1 = scmp.ge.s32.totalorder %s2762_s29, 2  ;;  %s2271_s20 = sand.u32 1, %s2742_s24  }
 0x354   : > { %p3226_p3 = scmp.ne.s32.totalorder %s3219_s13, 0  ;;  %s2272_s21 = scalar_lea.sflag [#allocation5], %s2271_s20 }
 0x356   : > { %p2593_p5 = pnand %p2598_p1, %p3226_p3 }
 0x358   : > { %2737 = dma.done.wait (!%p2593_p5), %s2272_s21, 128  }
 0x359   : > { %2739 = vsyncadd (!%p2593_p5), %s2272_s21, 4294967168  ;;  %s21_s29 = sadd.s32 1, %s2762_s29   ;;  %s3227_s24 = smov %s2746_s25 }
 0x35a   : > { %p18_p6 = scmp.ge.s32.totalorder %s21_s29, 4   ;;  %s3228_s25 = smov %s2750_s26 }
 0x35b   : > { %s3229_s26 = smov %s2863_s14  ;;  %s3230_s27 = smov %s2758_s28 }
 0x35c   : > { %s3231_s28 = smov %s3233_s9  ;;  %20 = sbr.rel (!%p18_p6) target bundleno = 5 (0x5), region = 96 }
 0x363   :  { %2277 = vsyncpa [#allocation4], 1 }
 0x364   :  { %2279 = vsyncpa [#allocation4 + $0x1], 1 }
 0x365   :  { %2280 = vsyncpa [#allocation5], 1 }
 0x366   :  { %2282 = vsyncpa [#allocation5 + $0x1], 1 }

</bundles_post_ra>
